<compile_context>
chip_gen: v6e
topology: v6e:2x2x1
jax: 0.10.0
libtpu: 0.0.40
codegen_flags: <defaults>
</compile_context>

<pallas_src>
import functools

import jax
import jax.numpy as jnp
from jax.experimental import pallas as pl
from jax.experimental.pallas import tpu as pltpu


# ----------------------------------------------------------------------------- kernel
def _hg_res_block_kernel(*refs, has_skip, matmul_dtype):
    if has_skip:
        (xm_ref, xt_ref, xb_ref,
         w1_ref, b1_ref, t2_ref,
         w2_ref, b2_ref,
         w3_ref, b3_ref,
         wsk_ref, bsk_ref,
         o_ref, pk_ref) = refs
    else:
        (xm_ref, xt_ref, xb_ref,
         w1_ref, b1_ref, t2_ref,
         w2_ref, b2_ref,
         w3_ref, b3_ref,
         o_ref, pk_ref) = refs

    _, TH, W, Cin = xm_ref.shape
    Cmid = w1_ref.shape[1]
    Cout = o_ref.shape[3]

    s = pl.program_id(1)
    n_strips = pl.num_programs(1)

    # ---- stage 1: (bn_1 folded) conv_1 -> relu -> +t2'   (t2' = t2/s2, s2 folded into w2)
    # One MXU matmul over the main strip plus both halo rows instead of three.
    x_all = jnp.concatenate([xt_ref[0], xm_ref[0], xb_ref[0]], axis=0)      # (TH+2, W, Cin)
    h1 = jnp.dot(x_all.reshape((TH + 2) * W, Cin).astype(matmul_dtype), w1_ref[...],
                 preferred_element_type=jnp.float32) + b1_ref[...]
    h1 = jnp.maximum(h1, 0.0) + t2_ref[...]
    sv = h1.astype(matmul_dtype).reshape(TH + 2, W, Cmid)                   # bf16 operand

    # ---- build the bf16 tap-packed conv_2 operand: three lane-slab writes at W offsets
    #      -1/0/+1 (border columns zeroed in place).  Scratch is fully rewritten every
    #      step, so nothing stale leaks between strips / cores.
    zc = jnp.zeros((TH + 2, 1, Cmid), sv.dtype)
    pk_ref[:, :, Cmid:2 * Cmid] = sv                                        # tap x   (kx=1)
    pk_ref[:, 1:W, 0:Cmid] = sv[:, 0:W - 1, :]                              # tap x-1 (kx=0)
    pk_ref[:, 0:1, 0:Cmid] = zc                                             #   zero pad col 0
    pk_ref[:, 0:W - 1, 2 * Cmid:3 * Cmid] = sv[:, 1:W, :]                   # tap x+1 (kx=2)
    pk_ref[:, W - 1:W, 2 * Cmid:3 * Cmid] = zc                              #   zero pad col W-1

    # Halo rows coming from outside the image must be zero (conv_2 zero padding in
    # bn_2-output space).  The halo BlockSpecs clamp to a valid row, so zero them here.
    @pl.when(s == 0)
    def _():
        pk_ref[0:1] = jnp.zeros((1, W, 3 * Cmid), pk_ref.dtype)

    @pl.when(s == n_strips - 1)
    def _():
        pk_ref[TH + 1:TH + 2] = jnp.zeros((1, W, 3 * Cmid), pk_ref.dtype)

    # ---- conv_2 (3x3, pad=1, s2 folded in): three K=3*Cmid matmuls over contiguous
    #      row-shifted windows of the packed scratch; bias added once before the ReLU.
    acc = None
    for ky in range(3):                                                     # static unroll
        part = jnp.dot(pk_ref[ky:ky + TH].reshape(TH * W, 3 * Cmid), w2_ref[ky],
                       preferred_element_type=jnp.float32)
        acc = part if acc is None else acc + part
    h = jnp.maximum(acc + b2_ref[...], 0.0)

    # ---- (bn_3 folded) conv_3 (1x1) -> relu
    h = jnp.dot(h.astype(matmul_dtype), w3_ref[...],
                preferred_element_type=jnp.float32) + b3_ref[...]
    h = jnp.maximum(h, 0.0)

    # ---- residual LAST (shortest live range; the x strip stays VMEM-resident anyway)
    if has_skip:
        res = jnp.dot(xm_ref[0].reshape(TH * W, Cin).astype(matmul_dtype), wsk_ref[...],
                      preferred_element_type=jnp.float32) + bsk_ref[...]
    else:
        res = xm_ref[0].reshape(TH * W, Cin)                                # Cin == Cout

    o_ref[0] = (h + res).reshape(TH, W, Cout).astype(o_ref.dtype)


# ----------------------------------------------------------------------------- helpers
def _fold_bn(gamma, beta, mean, var, eps):
    scale = (gamma / jnp.sqrt(var + eps)).astype(jnp.float32)
    shift = (beta - mean * scale).astype(jnp.float32)
    return scale, shift


def _vmem_limit_bytes():
    """Generation-aware scoped-VMEM limit (100 MiB on 128 MiB chips, ~40 MiB on v7x)."""
    try:
        cap = int(pltpu.get_tpu_info().vmem_capacity_bytes)
    except Exception:
        cap = 64 * 1024 * 1024
    return max(32 * 1024 * 1024, min(cap - 24 * 1024 * 1024, 100 * 1024 * 1024))


def _strip_vmem_bytes(TH, W, Cin, Cmid, Cout):
    f32, bf16 = 4, 2
    io = 2 * TH * W * (Cin + Cout) * f32 + 2 * 2 * W * Cin * f32    # double-buffered strips + halos
    scratch = (TH + 2) * W * 3 * Cmid * bf16                        # packed conv_2 operand
    temps = 8 * (TH + 2) * W * max(Cin, Cmid, Cout) * f32           # stage values / acc / relayouts
    return io + scratch + temps


def _pick_row_tile(B, H, W, Cin, Cmid, Cout, budget):
    divisors = [d for d in range(1, H + 1) if H % d == 0]
    fitting = [d for d in divisors if _strip_vmem_bytes(d, W, Cin, Cmid, Cout) <= budget]
    th = max(fitting) if fitting else 1
    # keep >= 2 parallel grid steps so both v7x TensorCores get work (harmless on 1-TC chips)
    if B * (H // th) < 2:
        smaller = [d for d in (fitting or divisors) if d <= H // 2]
        if smaller:
            th = max(smaller)
    return th


# ----------------------------------------------------------------------------- wrapper
def hg_res_block_nhwc(x, p, stride=1, eps=1e-5, row_tile=None,
                      matmul_dtype=jnp.bfloat16):
    """Fused HgResBlcok forward on an NHWC activation (eval-mode BatchNorm)."""
    assert stride == 1  # TODO(synk): stride>1 also breaks the residual add in the original module
    B, H, W, Cin = x.shape
    Cmid = p["conv1_w"].shape[0]
    Cout = p["conv3_w"].shape[0]
    has_skip = "skip_w" in p
    if not has_skip:
        assert Cin == Cout, "identity skip requires inplanes == outplanes"

    vmem_limit = _vmem_limit_bytes()
    TH = row_tile if row_tile is not None else _pick_row_tile(
        B, H, W, Cin, Cmid, Cout, budget=(vmem_limit * 3) // 5)
    assert H % TH == 0, "row_tile must divide H"
    n_strips = H // TH

    # ---- fold BN into the adjacent 1x1 / 3x3 weights at prep time (pure JAX, no kernel cost)
    s1, t1 = _fold_bn(*p["bn1"], eps)
    s2, t2 = _fold_bn(*p["bn2"], eps)
    s3, t3 = _fold_bn(*p["bn3"], eps)

    W1 = p["conv1_w"][:, :, 0, 0].T                                    # (Cin, Cmid)
    w1f = (s1[:, None] * W1).astype(matmul_dtype)
    b1f = (t1 @ W1 + p["conv1_b"]).reshape(1, -1).astype(jnp.float32)

    # bn_2: scale folded into w2's input-channel rows; t2' = t2/s2 stays in-kernel
    # (border pixels see zero padding, not t2, so it cannot move into the conv_2 bias).
    safe_s2 = jnp.where(s2 == 0, 1.0, s2)                              # guard degenerate gamma==0
    t2p = (t2 / safe_s2).reshape(1, -1).astype(jnp.float32)
    W2 = jnp.transpose(p["conv2_w"], (2, 3, 1, 0))                     # (ky, kx, cin, cout)
    w2f = (W2 * s2[None, None, :, None]).reshape(3, 3 * Cmid, Cmid).astype(matmul_dtype)
    b2 = p["conv2_b"].reshape(1, -1).astype(jnp.float32)

    W3 = p["conv3_w"][:, :, 0, 0].T                                    # (Cmid, Cout)
    w3f = (s3[:, None] * W3).astype(matmul_dtype)
    b3f = (t3 @ W3 + p["conv3_b"]).reshape(1, -1).astype(jnp.float32)

    vec = lambda b, s: (0, 0)
    mat3 = lambda b, s: (0, 0, 0)
    in_specs = [
        pl.BlockSpec((1, TH, W, Cin), lambda b, s: (b, s, 0, 0)),
        # 1-row halos above / below the strip (clamped at the image border; the kernel
        # zeroes the clamped rows so conv_2 sees proper zero padding).
        pl.BlockSpec((1, 1, W, Cin),
                     lambda b, s: (b, jnp.maximum(s * TH - 1, 0), 0, 0)),
        pl.BlockSpec((1, 1, W, Cin),
                     lambda b, s: (b, jnp.minimum((s + 1) * TH, H - 1), 0, 0)),
        pl.BlockSpec((Cin, Cmid), vec), pl.BlockSpec((1, Cmid), vec),        # w1f, b1f
        pl.BlockSpec((1, Cmid), vec),                                        # t2'
        pl.BlockSpec((3, 3 * Cmid, Cmid), mat3), pl.BlockSpec((1, Cmid), vec),  # w2f, b2
        pl.BlockSpec((Cmid, Cout), vec), pl.BlockSpec((1, Cout), vec),       # w3f, b3f
    ]
    args = [x, x, x, w1f, b1f, t2p, w2f, b2, w3f, b3f]
    if has_skip:
        wsk = p["skip_w"][:, :, 0, 0].T.astype(matmul_dtype)                 # (Cin, Cout)
        bsk = p["skip_b"].reshape(1, -1).astype(jnp.float32)
        in_specs += [pl.BlockSpec((Cin, Cout), vec), pl.BlockSpec((1, Cout), vec)]
        args += [wsk, bsk]

    kernel = functools.partial(_hg_res_block_kernel,
                               has_skip=has_skip, matmul_dtype=matmul_dtype)
    out = pl.pallas_call(
        kernel,
        out_shape=jax.ShapeDtypeStruct((B, H, W, Cout), x.dtype),
        grid_spec=pltpu.PrefetchScalarGridSpec(
            num_scalar_prefetch=0,
            grid=(B, n_strips),
            in_specs=in_specs,
            out_specs=pl.BlockSpec((1, TH, W, Cout), lambda b, s: (b, s, 0, 0)),
            scratch_shapes=[pltpu.VMEM((TH + 2, W, 3 * Cmid), matmul_dtype)]),
        compiler_params=pltpu.CompilerParams(
            dimension_semantics=("parallel", "parallel"),
            vmem_limit_bytes=int(vmem_limit)),
    )(*args)
    return out


def hg_res_block(x_nchw, p, stride=1, eps=1e-5, row_tile=None,
                 matmul_dtype=jnp.bfloat16):
    """NCHW wrapper matching the PyTorch module's layout.

    TODO(synk): in a full network keep activations NHWC end-to-end and call
    hg_res_block_nhwc directly -- each transpose here is an extra HBM round trip.
    """
    x = jnp.transpose(x_nchw, (0, 2, 3, 1))                # NCHW -> NHWC
    y = hg_res_block_nhwc(x, p, stride=stride, eps=eps, row_tile=row_tile,
                          matmul_dtype=matmul_dtype)
    return jnp.transpose(y, (0, 3, 1, 2))                  # NHWC -> NCHW


# ----------------------------------------------------------------------------- reference (plain JAX)
def reference(x, p, eps=1e-5):
    def bn(v, prm):
        g, b, m, var = prm
        r = lambda a: a[None, :, None, None]
        return (v - r(m)) / jnp.sqrt(r(var) + eps) * r(g) + r(b)

    def conv(v, w, b, pad):
        y = jax.lax.conv_general_dilated(v, w, (1, 1), pad,
                                         dimension_numbers=("NCHW", "OIHW", "NCHW"))
        return y + b[None, :, None, None]

    out = bn(x, p["bn1"])
    out = jax.nn.relu(conv(out, p["conv1_w"], p["conv1_b"], "VALID"))
    out = bn(out, p["bn2"])
    out = jax.nn.relu(conv(out, p["conv2_w"], p["conv2_b"], ((1, 1), (1, 1))))
    out = bn(out, p["bn3"])
    out = jax.nn.relu(conv(out, p["conv3_w"], p["conv3_b"], "VALID"))
    residual = conv(x, p["skip_w"], p["skip_b"], "VALID") if "skip_w" in p else x
    return out + residual


# ----------------------------------------------------------------------------- deterministic init
def init_params(key, inplanes, outplanes):
    mid = outplanes // 2
    ks = iter(jax.random.split(key, 24))
    n = lambda shape, s=0.1: s * jax.random.normal(next(ks), shape, jnp.float32)
    u = lambda shape: jax.random.uniform(next(ks), shape, jnp.float32, 0.5, 1.5)

    def bn(c):
        return (1.0 + n((c,)),          # gamma
                n((c,)),                # beta
                n((c,)),                # running_mean
                u((c,)))                # running_var (positive)

    p = {
        "bn1": bn(inplanes),
        "conv1_w": n((mid, inplanes, 1, 1)), "conv1_b": n((mid,)),
        "bn2": bn(mid),
        "conv2_w": n((mid, mid, 3, 3)), "conv2_b": n((mid,)),
        "bn3": bn(mid),
        "conv3_w": n((outplanes, mid, 1, 1)), "conv3_b": n((outplanes,)),
    }
    if inplanes != outplanes:
        p["skip_w"] = n((outplanes, inplanes, 1, 1))
        p["skip_b"] = n((outplanes,))
    return p


if __name__ == "__main__":
    B, H, W = 2, 16, 16
    key = jax.random.PRNGKey(0)
    kx1, kx2, kp1, kp2 = jax.random.split(key, 4)

    # case 1: inplanes != outplanes -> 1x1 skip conv; 2 row strips exercise the halo path
    x1 = jax.random.normal(kx1, (B, 4, H, W), jnp.float32)
    p1 = init_params(kp1, 4, 8)
    out1 = jax.block_until_ready(hg_res_block(x1, p1, row_tile=8))
    ref1 = reference(x1, p1)
    assert out1.shape == (B, 8, H, W)
    err1 = float(jnp.max(jnp.abs(out1 - ref1)))
    assert jnp.allclose(out1, ref1, rtol=3e-2, atol=3e-2), err1   # bf16 matmul tolerance

    # case 2: inplanes == outplanes -> identity skip; auto tile -> single strip
    x2 = jax.random.normal(kx2, (B, 8, H, W), jnp.float32)
    p2 = init_params(kp2, 8, 8)
    out2 = jax.block_until_ready(hg_res_block(x2, p2))
    ref2 = reference(x2, p2)
    assert out2.shape == (B, 8, H, W)
    err2 = float(jnp.max(jnp.abs(out2 - ref2)))
    assert jnp.allclose(out2, ref2, rtol=3e-2, atol=3e-2), err2

    print("KERNEL_OK")
</pallas_src>

<mosaic_0001>
module attributes {stable_mosaic.version = 11 : i64} {
  func.func @_hg_res_block_kernel(%arg0: i32, %arg1: i32, %arg2: memref<1x8x16x4xf32, #tpu.memory_space<vmem>>, %arg3: memref<1x1x16x4xf32, #tpu.memory_space<vmem>>, %arg4: memref<1x1x16x4xf32, #tpu.memory_space<vmem>>, %arg5: memref<4x4xbf16, #tpu.memory_space<vmem>>, %arg6: memref<1x4xf32, #tpu.memory_space<vmem>>, %arg7: memref<1x4xf32, #tpu.memory_space<vmem>>, %arg8: memref<3x12x4xbf16, #tpu.memory_space<vmem>>, %arg9: memref<1x4xf32, #tpu.memory_space<vmem>>, %arg10: memref<4x8xbf16, #tpu.memory_space<vmem>>, %arg11: memref<1x8xf32, #tpu.memory_space<vmem>>, %arg12: memref<4x8xbf16, #tpu.memory_space<vmem>>, %arg13: memref<1x8xf32, #tpu.memory_space<vmem>>, %arg14: memref<1x8x16x8xf32, #tpu.memory_space<vmem>>, %arg15: memref<10x16x12xbf16, #tpu.memory_space<vmem>>) attributes {dimension_semantics = [#tpu.dimension_semantics<parallel>, #tpu.dimension_semantics<parallel>], iteration_bounds = array<i64: 2, 2>, scalar_prefetch = 0 : i64, scratch_operands = 1 : i64, tpu.core_type = #tpu.core_type<tc>, window_params = [{transform_indices = @transform_0, window_bounds = array<i64: 1, 8, 16, 4>}, {transform_indices = @transform_1, window_bounds = array<i64: 1, 1, 16, 4>}, {transform_indices = @transform_2, window_bounds = array<i64: 1, 1, 16, 4>}, {pipeline_mode = #tpu.pipeline_mode<synchronous>, transform_indices = @transform_3, window_bounds = array<i64: 4, 4>}, {pipeline_mode = #tpu.pipeline_mode<synchronous>, transform_indices = @transform_4, window_bounds = array<i64: 1, 4>}, {pipeline_mode = #tpu.pipeline_mode<synchronous>, transform_indices = @transform_5, window_bounds = array<i64: 1, 4>}, {pipeline_mode = #tpu.pipeline_mode<synchronous>, transform_indices = @transform_6, window_bounds = array<i64: 3, 12, 4>}, {pipeline_mode = #tpu.pipeline_mode<synchronous>, transform_indices = @transform_7, window_bounds = array<i64: 1, 4>}, {pipeline_mode = #tpu.pipeline_mode<synchronous>, transform_indices = @transform_8, window_bounds = array<i64: 4, 8>}, {pipeline_mode = #tpu.pipeline_mode<synchronous>, transform_indices = @transform_9, window_bounds = array<i64: 1, 8>}, {pipeline_mode = #tpu.pipeline_mode<synchronous>, transform_indices = @transform_10, window_bounds = array<i64: 4, 8>}, {pipeline_mode = #tpu.pipeline_mode<synchronous>, transform_indices = @transform_11, window_bounds = array<i64: 1, 8>}, {transform_indices = @transform_12, window_bounds = array<i64: 1, 8, 16, 8>}]} {
    %c0 = arith.constant 0 : index
    %c0_0 = arith.constant 0 : index
    %c0_1 = arith.constant 0 : index
    %c0_2 = arith.constant 0 : index
    %0 = vector.load %arg3[%c0, %c0_0, %c0_1, %c0_2] : memref<1x1x16x4xf32, #tpu.memory_space<vmem>>, vector<1x1x16x4xf32>
    %1 = vector.shape_cast %0 : vector<1x1x16x4xf32> to vector<1x16x4xf32>
    %c0_3 = arith.constant 0 : index
    %c0_4 = arith.constant 0 : index
    %c0_5 = arith.constant 0 : index
    %c0_6 = arith.constant 0 : index
    %2 = vector.load %arg2[%c0_3, %c0_4, %c0_5, %c0_6] : memref<1x8x16x4xf32, #tpu.memory_space<vmem>>, vector<1x8x16x4xf32>
    %3 = vector.shape_cast %2 : vector<1x8x16x4xf32> to vector<8x16x4xf32>
    %c0_7 = arith.constant 0 : index
    %c0_8 = arith.constant 0 : index
    %c0_9 = arith.constant 0 : index
    %c0_10 = arith.constant 0 : index
    %4 = vector.load %arg4[%c0_7, %c0_8, %c0_9, %c0_10] : memref<1x1x16x4xf32, #tpu.memory_space<vmem>>, vector<1x1x16x4xf32>
    %5 = vector.shape_cast %4 : vector<1x1x16x4xf32> to vector<1x16x4xf32>
    %6 = tpu.concatenate %1, %3, %5 in 0 : vector<1x16x4xf32>, vector<8x16x4xf32>, vector<1x16x4xf32> -> vector<10x16x4xf32>
    %7 = vector.shape_cast %6 : vector<10x16x4xf32> to vector<160x4xf32>
    %8 = arith.truncf %7 : vector<160x4xf32> to vector<160x4xbf16>
    %c0_11 = arith.constant 0 : index
    %c0_12 = arith.constant 0 : index
    %9 = vector.load %arg5[%c0_11, %c0_12] : memref<4x4xbf16, #tpu.memory_space<vmem>>, vector<4x4xbf16>
    %cst = arith.constant dense<0.000000e+00> : vector<160x4xf32>
    %10 = tpu.matmul %8, %9, %cst {dimension_numbers = #tpu.dot_dimension_numbers<[1], [0], [0], [1], [0, 0, 1, 1], [], []>} : vector<160x4xbf16>, vector<4x4xbf16>, vector<160x4xf32> -> vector<160x4xf32>
    %c0_13 = arith.constant 0 : index
    %c0_14 = arith.constant 0 : index
    %11 = vector.load %arg6[%c0_13, %c0_14] : memref<1x4xf32, #tpu.memory_space<vmem>>, vector<1x4xf32>
    %12 = vector.broadcast %11 : vector<1x4xf32> to vector<160x4xf32>
    %13 = arith.addf %10, %12 : vector<160x4xf32>
    %cst_15 = arith.constant 0.000000e+00 : f32
    %14 = vector.broadcast %cst_15 : f32 to vector<160x4xf32>
    %15 = arith.maximumf %13, %14 : vector<160x4xf32>
    %c0_16 = arith.constant 0 : index
    %c0_17 = arith.constant 0 : index
    %16 = vector.load %arg7[%c0_16, %c0_17] : memref<1x4xf32, #tpu.memory_space<vmem>>, vector<1x4xf32>
    %17 = vector.broadcast %16 : vector<1x4xf32> to vector<160x4xf32>
    %18 = arith.addf %15, %17 : vector<160x4xf32>
    %19 = arith.truncf %18 : vector<160x4xf32> to vector<160x4xbf16>
    %20 = vector.shape_cast %19 : vector<160x4xbf16> to vector<10x16x4xbf16>
    %cst_18 = arith.constant 0.000000e+00 : bf16
    %21 = vector.broadcast %cst_18 : bf16 to vector<10x1x4xbf16>
    %c0_19 = arith.constant 0 : index
    %c0_20 = arith.constant 0 : index
    %c4 = arith.constant 4 : index
    %22 = vector.load %arg15[%c0_19, %c0_20, %c4] : memref<10x16x12xbf16, #tpu.memory_space<vmem>>, vector<10x16x4xbf16>
    tpu.vector_store %arg15[%c0_19, %c0_20, %c4], %20 {strides = array<i32>} : memref<10x16x12xbf16, #tpu.memory_space<vmem>>, vector<10x16x4xbf16>,
    %23 = vector.extract_strided_slice %20 {offsets = [0, 0, 0], sizes = [10, 15, 4], strides = [1, 1, 1]} : vector<10x16x4xbf16> to vector<10x15x4xbf16>
    %c0_21 = arith.constant 0 : index
    %c1 = arith.constant 1 : index
    %c0_22 = arith.constant 0 : index
    %24 = vector.load %arg15[%c0_21, %c1, %c0_22] : memref<10x16x12xbf16, #tpu.memory_space<vmem>>, vector<10x15x4xbf16>
    tpu.vector_store %arg15[%c0_21, %c1, %c0_22], %23 {strides = array<i32>} : memref<10x16x12xbf16, #tpu.memory_space<vmem>>, vector<10x15x4xbf16>,
    %c0_23 = arith.constant 0 : index
    %c0_24 = arith.constant 0 : index
    %c0_25 = arith.constant 0 : index
    %25 = vector.load %arg15[%c0_23, %c0_24, %c0_25] : memref<10x16x12xbf16, #tpu.memory_space<vmem>>, vector<10x1x4xbf16>
    tpu.vector_store %arg15[%c0_23, %c0_24, %c0_25], %21 {strides = array<i32>} : memref<10x16x12xbf16, #tpu.memory_space<vmem>>, vector<10x1x4xbf16>,
    %26 = vector.extract_strided_slice %20 {offsets = [0, 1, 0], sizes = [10, 15, 4], strides = [1, 1, 1]} : vector<10x16x4xbf16> to vector<10x15x4xbf16>
    %c0_26 = arith.constant 0 : index
    %c0_27 = arith.constant 0 : index
    %c8 = arith.constant 8 : index
    %27 = vector.load %arg15[%c0_26, %c0_27, %c8] : memref<10x16x12xbf16, #tpu.memory_space<vmem>>, vector<10x15x4xbf16>
    tpu.vector_store %arg15[%c0_26, %c0_27, %c8], %26 {strides = array<i32>} : memref<10x16x12xbf16, #tpu.memory_space<vmem>>, vector<10x15x4xbf16>,
    %c0_28 = arith.constant 0 : index
    %c15 = arith.constant 15 : index
    %c8_29 = arith.constant 8 : index
    %28 = vector.load %arg15[%c0_28, %c15, %c8_29] : memref<10x16x12xbf16, #tpu.memory_space<vmem>>, vector<10x1x4xbf16>
    tpu.vector_store %arg15[%c0_28, %c15, %c8_29], %21 {strides = array<i32>} : memref<10x16x12xbf16, #tpu.memory_space<vmem>>, vector<10x1x4xbf16>,
    %c0_i32 = arith.constant 0 : i32
    %29 = arith.cmpi eq, %arg1, %c0_i32 : i32
    %30 = arith.extui %29 : i1 to i32
    %c0_i32_30 = arith.constant 0 : i32
    %31 = arith.cmpi ne, %30, %c0_i32_30 : i32
    scf.if %31 {
      %cst_74 = arith.constant 0.000000e+00 : bf16
      %79 = vector.broadcast %cst_74 : bf16 to vector<1x16x12xbf16>
      %c0_75 = arith.constant 0 : index
      %c0_76 = arith.constant 0 : index
      %c0_77 = arith.constant 0 : index
      %80 = vector.load %arg15[%c0_75, %c0_76, %c0_77] : memref<10x16x12xbf16, #tpu.memory_space<vmem>>, vector<1x16x12xbf16>
      tpu.vector_store %arg15[%c0_75, %c0_76, %c0_77], %79 {strides = array<i32>} : memref<10x16x12xbf16, #tpu.memory_space<vmem>>, vector<1x16x12xbf16>,
    } else {
    }
    %c1_i32 = arith.constant 1 : i32
    %32 = arith.cmpi eq, %arg1, %c1_i32 : i32
    %33 = arith.extui %32 : i1 to i32
    %c0_i32_31 = arith.constant 0 : i32
    %34 = arith.cmpi ne, %33, %c0_i32_31 : i32
    scf.if %34 {
      %cst_74 = arith.constant 0.000000e+00 : bf16
      %79 = vector.broadcast %cst_74 : bf16 to vector<1x16x12xbf16>
      %c9 = arith.constant 9 : index
      %c0_75 = arith.constant 0 : index
      %c0_76 = arith.constant 0 : index
      %80 = vector.load %arg15[%c9, %c0_75, %c0_76] : memref<10x16x12xbf16, #tpu.memory_space<vmem>>, vector<1x16x12xbf16>
      tpu.vector_store %arg15[%c9, %c0_75, %c0_76], %79 {strides = array<i32>} : memref<10x16x12xbf16, #tpu.memory_space<vmem>>, vector<1x16x12xbf16>,
    } else {
    }
    %c0_32 = arith.constant 0 : index
    %c0_33 = arith.constant 0 : index
    %c0_34 = arith.constant 0 : index
    %35 = vector.load %arg15[%c0_32, %c0_33, %c0_34] : memref<10x16x12xbf16, #tpu.memory_space<vmem>>, vector<8x16x12xbf16>
    %36 = vector.shape_cast %35 : vector<8x16x12xbf16> to vector<128x12xbf16>
    %c0_35 = arith.constant 0 : index
    %c0_36 = arith.constant 0 : index
    %c0_37 = arith.constant 0 : index
    %37 = vector.load %arg8[%c0_35, %c0_36, %c0_37] : memref<3x12x4xbf16, #tpu.memory_space<vmem>>, vector<1x12x4xbf16>
    %38 = vector.shape_cast %37 : vector<1x12x4xbf16> to vector<12x4xbf16>
    %cst_38 = arith.constant dense<0.000000e+00> : vector<128x4xf32>
    %39 = tpu.matmul %36, %38, %cst_38 {dimension_numbers = #tpu.dot_dimension_numbers<[1], [0], [0], [1], [0, 0, 1, 1], [], []>} : vector<128x12xbf16>, vector<12x4xbf16>, vector<128x4xf32> -> vector<128x4xf32>
    %c1_39 = arith.constant 1 : index
    %c0_40 = arith.constant 0 : index
    %c0_41 = arith.constant 0 : index
    %40 = vector.load %arg15[%c1_39, %c0_40, %c0_41] : memref<10x16x12xbf16, #tpu.memory_space<vmem>>, vector<8x16x12xbf16>
    %41 = vector.shape_cast %40 : vector<8x16x12xbf16> to vector<128x12xbf16>
    %c1_42 = arith.constant 1 : index
    %c0_43 = arith.constant 0 : index
    %c0_44 = arith.constant 0 : index
    %42 = vector.load %arg8[%c1_42, %c0_43, %c0_44] : memref<3x12x4xbf16, #tpu.memory_space<vmem>>, vector<1x12x4xbf16>
    %43 = vector.shape_cast %42 : vector<1x12x4xbf16> to vector<12x4xbf16>
    %cst_45 = arith.constant dense<0.000000e+00> : vector<128x4xf32>
    %44 = tpu.matmul %41, %43, %cst_45 {dimension_numbers = #tpu.dot_dimension_numbers<[1], [0], [0], [1], [0, 0, 1, 1], [], []>} : vector<128x12xbf16>, vector<12x4xbf16>, vector<128x4xf32> -> vector<128x4xf32>
    %45 = arith.addf %39, %44 : vector<128x4xf32>
    %c2 = arith.constant 2 : index
    %c0_46 = arith.constant 0 : index
    %c0_47 = arith.constant 0 : index
    %46 = vector.load %arg15[%c2, %c0_46, %c0_47] : memref<10x16x12xbf16, #tpu.memory_space<vmem>>, vector<8x16x12xbf16>
    %47 = vector.shape_cast %46 : vector<8x16x12xbf16> to vector<128x12xbf16>
    %c2_48 = arith.constant 2 : index
    %c0_49 = arith.constant 0 : index
    %c0_50 = arith.constant 0 : index
    %48 = vector.load %arg8[%c2_48, %c0_49, %c0_50] : memref<3x12x4xbf16, #tpu.memory_space<vmem>>, vector<1x12x4xbf16>
    %49 = vector.shape_cast %48 : vector<1x12x4xbf16> to vector<12x4xbf16>
    %cst_51 = arith.constant dense<0.000000e+00> : vector<128x4xf32>
    %50 = tpu.matmul %47, %49, %cst_51 {dimension_numbers = #tpu.dot_dimension_numbers<[1], [0], [0], [1], [0, 0, 1, 1], [], []>} : vector<128x12xbf16>, vector<12x4xbf16>, vector<128x4xf32> -> vector<128x4xf32>
    %51 = arith.addf %45, %50 : vector<128x4xf32>
    %c0_52 = arith.constant 0 : index
    %c0_53 = arith.constant 0 : index
    %52 = vector.load %arg9[%c0_52, %c0_53] : memref<1x4xf32, #tpu.memory_space<vmem>>, vector<1x4xf32>
    %53 = vector.broadcast %52 : vector<1x4xf32> to vector<128x4xf32>
    %54 = arith.addf %51, %53 : vector<128x4xf32>
    %cst_54 = arith.constant 0.000000e+00 : f32
    %55 = vector.broadcast %cst_54 : f32 to vector<128x4xf32>
    %56 = arith.maximumf %54, %55 : vector<128x4xf32>
    %57 = arith.truncf %56 : vector<128x4xf32> to vector<128x4xbf16>
    %c0_55 = arith.constant 0 : index
    %c0_56 = arith.constant 0 : index
    %58 = vector.load %arg10[%c0_55, %c0_56] : memref<4x8xbf16, #tpu.memory_space<vmem>>, vector<4x8xbf16>
    %cst_57 = arith.constant dense<0.000000e+00> : vector<128x8xf32>
    %59 = tpu.matmul %57, %58, %cst_57 {dimension_numbers = #tpu.dot_dimension_numbers<[1], [0], [0], [1], [0, 0, 1, 1], [], []>} : vector<128x4xbf16>, vector<4x8xbf16>, vector<128x8xf32> -> vector<128x8xf32>
    %c0_58 = arith.constant 0 : index
    %c0_59 = arith.constant 0 : index
    %60 = vector.load %arg11[%c0_58, %c0_59] : memref<1x8xf32, #tpu.memory_space<vmem>>, vector<1x8xf32>
    %61 = vector.broadcast %60 : vector<1x8xf32> to vector<128x8xf32>
    %62 = arith.addf %59, %61 : vector<128x8xf32>
    %cst_60 = arith.constant 0.000000e+00 : f32
    %63 = vector.broadcast %cst_60 : f32 to vector<128x8xf32>
    %64 = arith.maximumf %62, %63 : vector<128x8xf32>
    %c0_61 = arith.constant 0 : index
    %c0_62 = arith.constant 0 : index
    %c0_63 = arith.constant 0 : index
    %c0_64 = arith.constant 0 : index
    %65 = vector.load %arg2[%c0_61, %c0_62, %c0_63, %c0_64] : memref<1x8x16x4xf32, #tpu.memory_space<vmem>>, vector<1x8x16x4xf32>
    %66 = vector.shape_cast %65 : vector<1x8x16x4xf32> to vector<8x16x4xf32>
    %67 = vector.shape_cast %66 : vector<8x16x4xf32> to vector<128x4xf32>
    %68 = arith.truncf %67 : vector<128x4xf32> to vector<128x4xbf16>
    %c0_65 = arith.constant 0 : index
    %c0_66 = arith.constant 0 : index
    %69 = vector.load %arg12[%c0_65, %c0_66] : memref<4x8xbf16, #tpu.memory_space<vmem>>, vector<4x8xbf16>
    %cst_67 = arith.constant dense<0.000000e+00> : vector<128x8xf32>
    %70 = tpu.matmul %68, %69, %cst_67 {dimension_numbers = #tpu.dot_dimension_numbers<[1], [0], [0], [1], [0, 0, 1, 1], [], []>} : vector<128x4xbf16>, vector<4x8xbf16>, vector<128x8xf32> -> vector<128x8xf32>
    %c0_68 = arith.constant 0 : index
    %c0_69 = arith.constant 0 : index
    %71 = vector.load %arg13[%c0_68, %c0_69] : memref<1x8xf32, #tpu.memory_space<vmem>>, vector<1x8xf32>
    %72 = vector.broadcast %71 : vector<1x8xf32> to vector<128x8xf32>
    %73 = arith.addf %70, %72 : vector<128x8xf32>
    %74 = arith.addf %64, %73 : vector<128x8xf32>
    %75 = vector.shape_cast %74 : vector<128x8xf32> to vector<8x16x8xf32>
    %c0_70 = arith.constant 0 : index
    %c0_71 = arith.constant 0 : index
    %c0_72 = arith.constant 0 : index
    %c0_73 = arith.constant 0 : index
    %76 = vector.load %arg14[%c0_70, %c0_71, %c0_72, %c0_73] : memref<1x8x16x8xf32, #tpu.memory_space<vmem>>, vector<1x8x16x8xf32>
    %77 = vector.shape_cast %76 : vector<1x8x16x8xf32> to vector<8x16x8xf32>
    %78 = vector.shape_cast %75 : vector<8x16x8xf32> to vector<1x8x16x8xf32>
    tpu.vector_store %arg14[%c0_70, %c0_71, %c0_72, %c0_73], %78 {strides = array<i32>} : memref<1x8x16x8xf32, #tpu.memory_space<vmem>>, vector<1x8x16x8xf32>,
    return
  }
  func.func @transform_0(%arg0: i32, %arg1: i32) -> (i32, i32, i32, i32) {
    %c0_i32 = arith.constant 0 : i32
    %c0_i32_0 = arith.constant 0 : i32
    %c0_i32_1 = arith.constant 0 : i32
    return %arg0, %arg1, %c0_i32, %c0_i32_0 : i32, i32, i32, i32
  }
  func.func @transform_1(%arg0: i32, %arg1: i32) -> (i32, i32, i32, i32) {
    %c8_i32 = arith.constant 8 : i32
    %0 = arith.muli %arg1, %c8_i32 : i32
    %c1_i32 = arith.constant 1 : i32
    %1 = arith.subi %0, %c1_i32 : i32
    %c0_i32 = arith.constant 0 : i32
    %2 = arith.maxsi %1, %c0_i32 : i32
    %c0_i32_0 = arith.constant 0 : i32
    %c0_i32_1 = arith.constant 0 : i32
    %c0_i32_2 = arith.constant 0 : i32
    return %arg0, %2, %c0_i32_0, %c0_i32_1 : i32, i32, i32, i32
  }
  func.func @transform_2(%arg0: i32, %arg1: i32) -> (i32, i32, i32, i32) {
    %c1_i32 = arith.constant 1 : i32
    %0 = arith.addi %arg1, %c1_i32 : i32
    %c8_i32 = arith.constant 8 : i32
    %1 = arith.muli %0, %c8_i32 : i32
    %c15_i32 = arith.constant 15 : i32
    %2 = arith.minsi %1, %c15_i32 : i32
    %c0_i32 = arith.constant 0 : i32
    %c0_i32_0 = arith.constant 0 : i32
    %c0_i32_1 = arith.constant 0 : i32
    return %arg0, %2, %c0_i32, %c0_i32_0 : i32, i32, i32, i32
  }
  func.func @transform_3(%arg0: i32, %arg1: i32) -> (i32, i32) {
    %c0_i32 = arith.constant 0 : i32
    %c0_i32_0 = arith.constant 0 : i32
    %c0_i32_1 = arith.constant 0 : i32
    return %c0_i32, %c0_i32_0 : i32, i32
  }
  func.func @transform_4(%arg0: i32, %arg1: i32) -> (i32, i32) {
    %c0_i32 = arith.constant 0 : i32
    %c0_i32_0 = arith.constant 0 : i32
    %c0_i32_1 = arith.constant 0 : i32
    return %c0_i32, %c0_i32_0 : i32, i32
  }
  func.func @transform_5(%arg0: i32, %arg1: i32) -> (i32, i32) {
    %c0_i32 = arith.constant 0 : i32
    %c0_i32_0 = arith.constant 0 : i32
    %c0_i32_1 = arith.constant 0 : i32
    return %c0_i32, %c0_i32_0 : i32, i32
  }
  func.func @transform_6(%arg0: i32, %arg1: i32) -> (i32, i32, i32) {
    %c0_i32 = arith.constant 0 : i32
    %c0_i32_0 = arith.constant 0 : i32
    %c0_i32_1 = arith.constant 0 : i32
    %c0_i32_2 = arith.constant 0 : i32
    return %c0_i32, %c0_i32_0, %c0_i32_1 : i32, i32, i32
  }
  func.func @transform_7(%arg0: i32, %arg1: i32) -> (i32, i32) {
    %c0_i32 = arith.constant 0 : i32
    %c0_i32_0 = arith.constant 0 : i32
    %c0_i32_1 = arith.constant 0 : i32
    return %c0_i32, %c0_i32_0 : i32, i32
  }
  func.func @transform_8(%arg0: i32, %arg1: i32) -> (i32, i32) {
    %c0_i32 = arith.constant 0 : i32
    %c0_i32_0 = arith.constant 0 : i32
    %c0_i32_1 = arith.constant 0 : i32
    return %c0_i32, %c0_i32_0 : i32, i32
  }
  func.func @transform_9(%arg0: i32, %arg1: i32) -> (i32, i32) {
    %c0_i32 = arith.constant 0 : i32
    %c0_i32_0 = arith.constant 0 : i32
    %c0_i32_1 = arith.constant 0 : i32
    return %c0_i32, %c0_i32_0 : i32, i32
  }
  func.func @transform_10(%arg0: i32, %arg1: i32) -> (i32, i32) {
    %c0_i32 = arith.constant 0 : i32
    %c0_i32_0 = arith.constant 0 : i32
    %c0_i32_1 = arith.constant 0 : i32
    return %c0_i32, %c0_i32_0 : i32, i32
  }
  func.func @transform_11(%arg0: i32, %arg1: i32) -> (i32, i32) {
    %c0_i32 = arith.constant 0 : i32
    %c0_i32_0 = arith.constant 0 : i32
    %c0_i32_1 = arith.constant 0 : i32
    return %c0_i32, %c0_i32_0 : i32, i32
  }
  func.func @transform_12(%arg0: i32, %arg1: i32) -> (i32, i32, i32, i32) {
    %c0_i32 = arith.constant 0 : i32
    %c0_i32_0 = arith.constant 0 : i32
    %c0_i32_1 = arith.constant 0 : i32
    return %arg0, %arg1, %c0_i32, %c0_i32_0 : i32, i32, i32, i32
  }
}

</mosaic_0001>

<bundles_post_ra>
// kernel: tpu_custom_call.1
= control target key start
LH: loop header
LB: loop body
LE: loop exit
PB: predicated region body
PF: predicated region fallthrough
CT: control target
= control target key end

     0   :  { %s3096_s21 = smov 0   ;;  %s3098_s22 = smov 0   ;;  %s4069_s0 = inlined_call_operand.vmem [shape: f32[2,16,16,4], index: 0, kind: input, shape index: {}]   ;;  %s4070_s1 = inlined_call_operand.vmem [shape: f32[2,16,16,4], index: 1, kind: input, shape index: {}]   ;;  %s4071_s2 = inlined_call_operand.vmem [shape: f32[2,16,16,4], index: 2, kind: input, shape index: {}]   ;;  %s4072_s3 = inlined_call_operand.vmem [shape: bf16[4,4], index: 3, kind: input, shape index: {}]   ;;  %s4073_s4 = inlined_call_operand.vmem [shape: f32[1,4], index: 4, kind: input, shape index: {}]   ;;  %s4074_s5 = inlined_call_operand.vmem [shape: f32[1,4], index: 5, kind: input, shape index: {}]   ;;  %s4075_s6 = inlined_call_operand.vmem [shape: bf16[3,12,4], index: 6, kind: input, shape index: {}]   ;;  %s4076_s7 = inlined_call_operand.vmem [shape: f32[1,4], index: 7, kind: input, shape index: {}]   ;;  %s4077_s8 = inlined_call_operand.vmem [shape: bf16[4,8], index: 8, kind: input, shape index: {}]   ;;  %s4078_s9 = inlined_call_operand.vmem [shape: f32[1,8], index: 9, kind: input, shape index: {}]   ;;  %s4079_s10 = inlined_call_operand.vmem [shape: bf16[4,8], index: 10, kind: input, shape index: {}]   ;;  %s4080_s11 = inlined_call_operand.vmem [shape: f32[1,8], index: 11, kind: input, shape index: {}]   ;;  %s4081_s12 = inlined_call_operand.vmem [shape: f32[2,16,16,8], index: 12, kind: output, shape index: {}]  }
   0x1   :  { %4103 = sst [smem:[#allocation9_spill]] %s4072_s3  ;;  %s3100_s23 = smov 0  }
   0x2   :  { %s3102_s24 = smov 0   ;;  %s3104_s25 = smov 0  }
   0x3 LB: > { %s31_s26 = sadd.s32 1, %s3017_s23  ;;  %s34_s27 = sadd.s32 1, %s3021_s24  ;;  %s3025_s25 = sphi %s3104_s25, %s22_s25   ;;  %s3021_s24 = sphi %s3102_s24, %s4164_s24   ;;  %s3017_s23 = sphi %s3100_s23, %s4163_s23   ;;  %s3013_s22 = sphi %s3098_s22, %s4162_s22   ;;  %s3009_s21 = sphi %s3096_s21, %s4161_s21  }
   0x4   : > { %p32_p0 = scmp.ge.s32.totalorder %s31_s26, 2  ;;  %p2578_p1 = scmp.ge.s32.totalorder %s3025_s25, 1 }
   0x5   : > { %p448_p2 = scmp.lt.s32.totalorder %s3025_s25, 5 }
   0x6   : > { %s4166_s26 = smov (%p32_p0, %s31_s26), 0  ;;  %s4168_s27 = smov (!%p32_p0, %s34_s27), %s3021_s24 }
   0x7   : > { %p449_p3 = pnand %p2578_p1, %p448_p2  ;;  %p36_p4 = scmp.ge.s32.totalorder %s4168_s27, 2 }
   0x9   : > { %s4170_s27 = smov (%p36_p4, %s4168_s27), 0  ;;  %452 = sbr.rel (%p449_p3) target bundleno = 918 (0x396), region = 68 }
   0xa   : > { %4104 = sst [smem:[#allocation3_spill]] %s4170_s27 }
   0xe   : > { %s4105_s3 = sld [smem:[#allocation9_spill]]  ;;  %vm652_vm0 = vcmask 1041408   ;;  %s3132_s30 = sshll.u32 %s3009_s21, 3  ;;  %vm621_vm1 = vcmask 31744   ;;  %v3198_v32 = vld [vmem:[%s4073_s4] ss:$0 sm:$0xff] }
   0xf   : > { %p527_p5 = scmp.lt.s32.totalorder %s3013_s22, 1  ;;  %p529_p6 = scmp.lt.s32.totalorder %s3132_s30, 15  ;;  %v3204_v35 = vld [vmem:[%s4074_s5] ss:$0 sm:$0xff]  ;;  %vm1216_vm2 = vsmask.f32 3328 }
  0x10   : > { %s2584_s13 = sadd.s32 4294967295, %s3132_s30  ;;  %vm1217_vm3 = vsmask.f32 7440  ;;  %s3028_s19 = smov 8   ;;  %vm957_vm5 = vsmask.f32 256 }
  0x11   : > { %s4172_s22 = smov (!%p527_p5, %s3013_s22), 1  ;;  %p539_p7 = scmp.gt.s32.totalorder %s2584_s13, 0  ;;  %vm3246_vm4 = vmor %vm1216_vm2, %vm1217_vm3  ;;  %vm958_vm6 = vsmask.f32 4368  ;;  %vm936_vm8 = vcmask 60448   ;;  %vm1140_vm9 = vcmask 27648  }
  0x12   : > { %s530_s14 = scalar_select %p529_p6, %s3132_s30, 15  ;;  %vm3506_vm7 = vmor %vm957_vm5, %vm958_vm6  ;;  %vm1141_vm10 = vsmask.f32 7938  ;;  %vm1184_vm12 = vcmask 24576   ;;  %vm1369_vm14 = vcmask 93248   ;;  %vm1412_vm3 = vcmask 93251  }
  0x13   : > { %s3139_s15 = sshll.u32 %s4172_s22, 5  ;;  %p2585_p8 = scmp.lt.s32.totalorder %s2584_s13, 15  ;;  %vm3702_vm11 = vmand %vm1140_vm9, %vm1141_vm10 }
  0x14   : > { %v613_v0 = vld [vmem:[%s4105_s3] sm:$0x3]  ;;  %s2580_s16 = sshll.u32 %s530_s14, 1  ;;  %s4174_s13 = smov (!%p539_p7, %s2584_s13), 0  ;;  %vm3719_vm13 = vmand %vm1184_vm12, %vm957_vm5 }
  0x15   : > { %2910 = vmatprep.subr.msk.bf16.mxu0 %vm652_vm0, %v613_v0  ;;  %v654_v1 = vsel %vm652_vm0, %v613_v0, 0  ;;  %s533_s17 = sadd.s32 %s3139_s15, %s2580_s16  ;;  %s4176_s13 = smov (!%p2585_p8, %s4174_s13), 15  ;;  %vm3737_vm15 = vmand %vm1369_vm14, %vm1216_vm2  ;;  %vm1413_vm2 = vsmask.f32 7950 }
  0x16   : > { %2799 = vmatpush3.bf16.msra.mxu0 %v654_v1  ;;  %s2582_s18 = sshll.u32 %s533_s17, 3  ;;  %s2590_s22 = sshll.u32 %s4176_s13, 1 }
  0x17   : > { %s3145_s28 = scalar_lea.vmem %s4081_s12, %s2582_s18  ;;  %s3150_s27 = scalar_lea.vmem %s4069_s0, %s2582_s18 }
  0x18   : > { %s547_s14 = sadd.s32 %s2590_s22, %s3139_s15  ;;  %v585_v2 = vld [vmem:[%s3150_s27] sm:$0xff]  ;;  %v586_v3 = vld [vmem:[%s3150_s27 + $0x8] sm:$0xff]  ;;  %v587_v4 = vld [vmem:[%s3150_s27 + $0x10] sm:$0xff]  ;;  %s2721_s13 = sadd.s32 8, %s3132_s30 }
  0x19   : > { %s2592_s16 = sshll.u32 %s547_s14, 3  ;;  %v588_v5 = vld [vmem:[%s3150_s27 + $0x18] sm:$0xff]  ;;  %v604_v8 = vpack.c.bf16 %v586_v3, %v585_v2  ;;  %p3163_p9 = scmp.lt.s32.totalorder %s2721_s13, 15  ;;  %v589_v11 = vld [vmem:[%s3150_s27 + $0x20] sm:$0xff]  ;;  %v590_v12 = vld [vmem:[%s3150_s27 + $0x28] sm:$0xff] }
  0x1a   : > { %s549_s18 = scalar_lea.vmem %s4070_s1, %s2592_s16  ;;  %v605_v10 = vpack.c.bf16 %v588_v5, %v587_v4  ;;  %v591_v13 = vld [vmem:[%s3150_s27 + $0x30] sm:$0xff]  ;;  %v592_v14 = vld [vmem:[%s3150_s27 + $0x38] sm:$0xff]  ;;  %v606_v15 = vpack.c.bf16 %v590_v12, %v589_v11  ;;  %v593_v17 = vld [vmem:[%s3150_s27 + $0x40] sm:$0xff]  ;;  %p2636_p10 = scmp.ne.s32.totalorder %s3009_s21, 0 }
  0x1b   : > { %v583_v6 = vld [vmem:[%s549_s18] sm:$0xff]  ;;  %v584_v7 = vld [vmem:[%s549_s18 + $0x8] sm:$0xff]  ;;  %s4178_s13 = smov (!%p3163_p9, %s2721_s13), 15  ;;  %v607_v16 = vpack.c.bf16 %v592_v14, %v591_v13  ;;  %v595_v19 = vld [vmem:[%s3150_s27 + $0x50] sm:$0xff] }
  0x1c   : > { %v603_v9 = vpack.c.bf16 %v584_v7, %v583_v6  ;;  %s4180_s13 = smov (!%p3163_p9, %s4178_s13), 15  ;;  %v594_v18 = vld [vmem:[%s3150_s27 + $0x48] sm:$0xff]  ;;  %v596_v20 = vld [vmem:[%s3150_s27 + $0x58] sm:$0xff]  ;;  %v597_v23 = vld [vmem:[%s3150_s27 + $0x60] sm:$0xff] }
  0x1d   : > { %v608_v21 = vpack.c.bf16 %v594_v18, %v593_v17  ;;  %s2597_s30 = sshll.u32 %s4180_s13, 1  ;;  %v609_v22 = vpack.c.bf16 %v596_v20, %v595_v19  ;;  %v598_v24 = vld [vmem:[%s3150_s27 + $0x68] sm:$0xff]  ;;  %v599_v25 = vld [vmem:[%s3150_s27 + $0x70] sm:$0xff]  ;;  %v600_v26 = vld [vmem:[%s3150_s27 + $0x78] sm:$0xff]  ;;  %s3027_s13 = smov 4  }
  0x1e   : > { %2800 = vmatprep.mubr.msk.bf16.mxu0 %vm621_vm1, %v603_v9  ;;  %s564_s20 = sadd.s32 %s2597_s30, %s3139_s15  ;;  %v610_v27 = vpack.c.bf16 %v598_v24, %v597_v23  ;;  %v611_v28 = vpack.c.bf16 %v600_v26, %v599_v25 }
  0x1f   : > { %2801 = vmatmul.mubr.msk.bf16.vlgmr.msra.gmra.mxu0 %vm621_vm1, %v604_v8  ;;  %s2599_s29 = sshll.u32 %s564_s20, 3 }
  0x20   : > { %2804 = vmatprep.mubr.msk.bf16.mxu0 %vm621_vm1, %v605_v10  ;;  %s566_s16 = scalar_lea.vmem %s4071_s2, %s2599_s29 }
  0x21   : > { %v601_v29 = vld [vmem:[%s566_s16] sm:$0xff]  ;;  %v602_v30 = vld [vmem:[%s566_s16 + $0x8] sm:$0xff] }
  0x22   : > { %v612_v31 = vpack.c.bf16 %v602_v30, %v601_v29 }
  0x27   : > { %2805 = vmatmul.mubr.msk.bf16.gmra.mxu0 %vm621_vm1, %v606_v15 }
  0x28   : > { %2808 = vmatprep.mubr.msk.bf16.mxu0 %vm621_vm1, %v607_v16 }
  0x2f   : > { %2809 = vmatmul.mubr.msk.bf16.gmra.mxu0 %vm621_vm1, %v608_v21 }
  0x30   : > { %2812 = vmatprep.mubr.msk.bf16.mxu0 %vm621_vm1, %v609_v22 }
  0x37   : > { %2813 = vmatmul.mubr.msk.bf16.gmra.mxu0 %vm621_vm1, %v610_v27 }
  0x38   : > { %2816 = vmatprep.mubr.msk.bf16.mxu0 %vm621_vm1, %v611_v28 }
  0x3f   : > { %2817 = vmatmul.mubr.msk.bf16.gmra.mxu0 %vm621_vm1, %v612_v31 }
  0xdf   : > { %v2802_v33 = vpop.f32.mrf.mxu0 }
  0xe0   : > { %v699_v34 = vadd.f32 %v2802_v33, %v3198_v32 }
  0xe1   : > { %v690_v36 = vpop.f32.mrf.mxu0 }
  0xe2   : > { %v771_v37 = vmax.f32 %v699_v34, 0.0  ;;  %v691_v38 = vadd.f32 %v3198_v32, %v690_v36 }
  0xe3   : > { %v2803_v39 = vpop.f32.mrf.mxu0 }
  0xe4   : > { %v798_v40 = vadd.f32 %v3204_v35, %v771_v37  ;;  %v769_v41 = vmax.f32 %v691_v38, 0.0  ;;  %v702_v42 = vadd.f32 %v2803_v39, %v3198_v32 }
  0xe5   : > { %v693_v43 = vpop.f32.mrf.mxu0 }
  0xe6   : > { %v3209_v44 = vpack.c.bf16 %v798_v40, %v798_v40  ;;  %v796_v45 = vadd.f32 %v3204_v35, %v769_v41  ;;  %v772_v46 = vmax.f32 %v702_v42, 0.0  ;;  %v694_v47 = vadd.f32 %v3198_v32, %v693_v43 }
  0xe7   : > { %v2806_v48 = vpop.f32.mrf.mxu0 }
  0xe8   : > { %v977_v49 = vshrl.u32 %v3209_v44, 16  ;;  %v3214_v50 = vpack.c.bf16 %v796_v45, %v796_v45  ;;  %v799_v51 = vadd.f32 %v3204_v35, %v772_v46  ;;  %880 = vrot.lane.b32.xlu1 %v3209_v44, %s3027_s13  ;;  %v980_v52 = vshll.u32 %v3209_v44, 16 }
  0xe9   : > { %v770_v53 = vmax.f32 %v694_v47, 0.0  ;;  %v715_v54 = vadd.f32 %v2806_v48, %v3198_v32  ;;  %v706_v55 = vpop.f32.mrf.mxu0 }
  0xea   : > { %v3221_v56 = vpack.c.bf16 %v799_v51, %v799_v51  ;;  %876 = vrot.lane.b32.xlu0 %v3214_v50, %s3027_s13  ;;  %v707_v59 = vadd.f32 %v3198_v32, %v706_v55  ;;  %v1228_v63 = vrot.slane %v977_v49, 4  ;;  %v1229_v4 = vrot.slane %v980_v52, 5 }
  0xeb   : > { %v797_v57 = vadd.f32 %v3204_v35, %v770_v53  ;;  %v775_v58 = vmax.f32 %v715_v54, 0.0  ;;  %v2807_v60 = vpop.f32.mrf.mxu0  ;;  %v961_v18 = vshrl.u32 %v3214_v50, 16  ;;  %v4097_v24 = vshll.u32 %v3214_v50, 16 }
  0xec   : > { %v4093_v61 = vshll.u32 %v3221_v56, 16  ;;  %v718_v62 = vadd.f32 %v2807_v60, %v3198_v32  ;;  %882 = vrot.lane.b32.xlu1 %v3221_v56, %s3027_s13  ;;  %v773_v2 = vmax.f32 %v707_v59, 0.0  ;;  %v1230_v7 = vor.u32 %v1229_v4, %v1228_v63 }
  0xed   : > { %v3231_v0 = vpack.c.bf16 %v797_v57, %v797_v57  ;;  %v802_v1 = vadd.f32 %v3204_v35, %v775_v58  ;;  %v709_v3 = vpop.f32.mrf.mxu0  ;;  %v985_v16 = vshrl.u32 %v3221_v56, 16  ;;  %v3267_v30 = vrot.slane %v977_v49, 7 }
  0xee   : > { %v776_v5 = vmax.f32 %v718_v62, 0.0  ;;  %v800_v9 = vadd.f32 %v3204_v35, %v773_v2  ;;  %v710_v10 = vadd.f32 %v3198_v32, %v709_v3  ;;  %v1232_v11 = vrot.slane %v4093_v61, 5 }
  0xef   : > { %878 = vrot.lane.b32.xlu0 %v3231_v0, %s3027_s13  ;;  %v2810_v6 = vpop.f32.mrf.mxu0  ;;  %v3238_v8 = vpack.c.bf16 %v802_v1, %v802_v1  ;;  %v1231_v15 = vrot.slane %v1230_v7, 4  ;;  %v969_v27 = vshrl.u32 %v3231_v0, 16  ;;  %v1234_v28 = vrot.slane %v985_v16, 4 }
  0xf0   : > { %v803_v13 = vadd.f32 %v3204_v35, %v776_v5  ;;  %v3254_v19 = vpack.c.bf16 %v800_v9, %v800_v9  ;;  %v774_v20 = vmax.f32 %v710_v10, 0.0  ;;  %v731_v21 = vadd.f32 %v2810_v6, %v3198_v32 }
  0xf1   : > { %v722_v12 = vpop.f32.mrf.mxu0  ;;  %v1233_v22 = vsel %vm3246_vm4, %v1231_v15, %v1232_v11  ;;  %v3269_v31 = vrot.slane %v961_v18, 7  ;;  %v4092_v33 = vshll.u32 %v3231_v0, 16  ;;  %v1009_v36 = vshrl.u32 %v3238_v8, 16 }
  0xf2   : > { %v3260_v25 = vpack.c.bf16 %v803_v13, %v803_v13  ;;  %1313 = vrot.lane.b32.xlu1 %v1233_v22, %s3028_s19  ;;  %v723_v26 = vadd.f32 %v3198_v32, %v722_v12  ;;  %v801_v37 = vadd.f32 %v3204_v35, %v774_v20  ;;  %v779_v38 = vmax.f32 %v731_v21, 0.0 }
  0xf3   : > { %888 = vrot.lane.b32.xlu0 %v3238_v8, %s3027_s13  ;;  %v2811_v17 = vpop.f32.mrf.mxu0  ;;  %v1235_v39 = vor.u32 %v1234_v28, %v1232_v11  ;;  %v3275_v41 = vrot.slane %v985_v16, 7  ;;  %v1219_v43 = vrot.slane %v961_v18, 4  ;;  %v1220_v45 = vrot.slane %v4097_v24, 5 }
  0xf4   : > { %v734_v34 = vadd.f32 %v2811_v17, %v3198_v32  ;;  %v777_v42 = vmax.f32 %v723_v26, 0.0  ;;  %v3281_v46 = vrot.slane %v969_v27, 7  ;;  %v4088_v47 = vshll.u32 %v3238_v8, 16 }
  0xf5   : > { %v725_v23 = vpop.f32.mrf.mxu0  ;;  %v993_v48 = vshrl.u32 %v3254_v19, 16  ;;  %v1017_v49 = vshrl.u32 %v3260_v25, 16  ;;  %v1236_v54 = vrot.slane %v1235_v39, 4  ;;  %v1221_v55 = vor.u32 %v1220_v45, %v1219_v43 }
  0xf6   : > { %890 = vrot.lane.b32.xlu1 %v3260_v25, %s3027_s13  ;;  %v780_v53 = vmax.f32 %v734_v34, 0.0  ;;  %v1223_v57 = vrot.slane %v4092_v33, 5  ;;  %v3290_v58 = vrot.slane %v1009_v36, 7  ;;  %v4087_v59 = vshll.u32 %v3260_v25, 16 }
  0xf7   : > { %884 = vrot.lane.b32.xlu0 %v3254_v19, %s3027_s13  ;;  %v2814_v29 = vpop.f32.mrf.mxu0  ;;  %v3293_v60 = vpack.c.bf16 %v801_v37, %v801_v37  ;;  %v806_v62 = vadd.f32 %v3204_v35, %v779_v38  ;;  %v804_v1 = vadd.f32 %v3204_v35, %v777_v42  ;;  %v726_v2 = vadd.f32 %v3198_v32, %v725_v23 }
  0xf8   : > { %v747_v3 = vadd.f32 %v2814_v29, %v3198_v32  ;;  %v1222_v4 = vrot.slane %v1221_v55, 4  ;;  %v4086_v5 = vshll.u32 %v3254_v19, 16  ;;  %v1225_v9 = vrot.slane %v969_v27, 4 }
  0xf9   : > { %v738_v40 = vpop.f32.mrf.mxu0  ;;  %v3303_v11 = vrot.slane %v993_v48, 7  ;;  %v3305_v12 = vrot.slane %v1017_v49, 7  ;;  %v807_v13 = vadd.f32 %v3204_v35, %v780_v53  ;;  %v1001_v16 = vshrl.u32 %v3293_v60, 16 }
  0xfa   : > { %1315 = vrot.lane.b32.xlu1 %v1236_v54, %s3028_s19  ;;  %v739_v6 = vadd.f32 %v3198_v32, %v738_v40  ;;  %v1224_v15 = vsel %vm3246_vm4, %v1222_v4, %v1223_v57  ;;  %v4083_v17 = vshll.u32 %v3293_v60, 16  ;;  %v3312_v18 = vpack.c.bf16 %v806_v62, %v806_v62 }
  0xfb   : > { %v2815_v51 = vpop.f32.mrf.mxu0  ;;  %1309 = vrot.lane.b32.xlu0 %v1224_v15, %s3028_s19  ;;  %v1226_v20 = vor.u32 %v1225_v9, %v1223_v57  ;;  %v3315_v22 = vpack.c.bf16 %v804_v1, %v804_v1  ;;  %v778_v23 = vmax.f32 %v726_v2, 0.0  ;;  %v783_v26 = vmax.f32 %v747_v3, 0.0 }
  0xfc   : > { %v750_v7 = vadd.f32 %v2815_v51, %v3198_v32  ;;  %v3321_v27 = vrot.slane %v4087_v59, 5  ;;  %v781_v28 = vmax.f32 %v739_v6, 0.0  ;;  %v1252_v37 = vrot.slane %v1017_v49, 4 }
  0xfd   : > { %v741_v63 = vpop.f32.mrf.mxu0  ;;  %v1227_v34 = vrot.slane %v1226_v20, 4  ;;  %v3323_v38 = vpack.c.bf16 %v807_v13, %v807_v13  ;;  %v3328_v45 = vrot.slane %v1001_v16, 7  ;;  %v4095_v51 = vshrl.u32 %v3312_v18, 16 }
  0xfe   : > { %886 = vrot.lane.b32.xlu1 %v3293_v60, %s3027_s13  ;;  %v784_v29 = vmax.f32 %v750_v7, 0.0  ;;  %v742_v39 = vadd.f32 %v3198_v32, %v741_v63  ;;  %v1253_v54 = vor.u32 %v1252_v37, %v3321_v27  ;;  %v4091_v49 = vshrl.u32 %v3315_v22, 16 }
  0xff   : > { %v2818_v10 = vpop.f32.mrf.mxu0  ;;  %1311 = vrot.lane.b32.xlu0 %v1227_v34, %s3028_s19  ;;  %v805_v55 = vadd.f32 %v3204_v35, %v778_v23  ;;  %v810_v63 = vadd.f32 %v3204_v35, %v783_v26  ;;  %v808_v1 = vadd.f32 %v3204_v35, %v781_v28  ;;  %v1237_v3 = vrot.slane %v993_v48, 4 }
 0x100   : > { %v763_v40 = vadd.f32 %v2818_v10, %v3198_v32  ;;  %v811_v2 = vadd.f32 %v3204_v35, %v784_v29  ;;  %v782_v4 = vmax.f32 %v742_v39, 0.0  ;;  %v1254_v7 = vrot.slane %v1253_v54, 4 }
 0x101   : > { %v754_v21 = vpop.f32.mrf.mxu0  ;;  %v3345_v13 = vrot.slane %v4095_v51, 7  ;;  %v4082_v20 = vshll.u32 %v3323_v38, 16  ;;  %v1238_v48 = vrot.slane %v4086_v5, 5  ;;  %v1049_v23 = vshrl.u32 %v3323_v38, 16 }
 0x102   : > { %v755_v42 = vadd.f32 %v3198_v32, %v754_v21  ;;  %898 = vrot.lane.b32.xlu1 %v3323_v38, %s3027_s13  ;;  %v787_v6 = vmax.f32 %v763_v40, 0.0  ;;  %v3355_v21 = vrot.slane %v4091_v49, 7  ;;  %v3358_v26 = vpack.c.bf16 %v805_v55, %v805_v55 }
 0x103   : > { %v2819_v43 = vpop.f32.mrf.mxu0  ;;  %896 = vrot.lane.b32.xlu0 %v3312_v18, %s3027_s13  ;;  %v3361_v29 = vpack.c.bf16 %v810_v63, %v810_v63  ;;  %v1239_v34 = vor.u32 %v1238_v48, %v1237_v3  ;;  %v1241_v37 = vrot.slane %v4083_v17, 5  ;;  %v3366_v40 = vpack.c.bf16 %v808_v1, %v808_v1 }
 0x104   : > { %v785_v57 = vmax.f32 %v755_v42, 0.0  ;;  %v766_v62 = vadd.f32 %v2819_v43, %v3198_v32  ;;  %v3368_v42 = vpack.c.bf16 %v811_v2, %v811_v2  ;;  %v809_v43 = vadd.f32 %v3204_v35, %v782_v4 }
 0x105   : > { %v757_v10 = vpop.f32.mrf.mxu0  ;;  %v814_v54 = vadd.f32 %v3204_v35, %v787_v6  ;;  %v1240_v55 = vrot.slane %v1239_v34, 4  ;;  %v3376_v63 = vrot.slane %v4082_v20, 5  ;;  %v3378_v3 = vrot.slane %v1049_v23, 7 }
 0x106   : > { %v812_v9 = vadd.f32 %v3204_v35, %v785_v57  ;;  %1323 = vrot.lane.b32.xlu1 %v1254_v7, %s3028_s19  ;;  %v788_v28 = vmax.f32 %v766_v62, 0.0  ;;  %v758_v39 = vadd.f32 %v3198_v32, %v757_v10  ;;  %v1243_v62 = vrot.slane %v1001_v16, 4 }
 0x107   : > { %892 = vrot.lane.b32.xlu0 %v3315_v22, %s3027_s13  ;;  %v4084_v32 = vshll.u32 %v3358_v26, 16  ;;  %v1270_v2 = vrot.slane %v1049_v23, 4  ;;  %v1033_v4 = vshrl.u32 %v3358_v26, 16  ;;  %v4085_v6 = vshll.u32 %v3368_v42, 16 }
 0x108   : > { %v786_v57 = vmax.f32 %v758_v39, 0.0  ;;  %v815_v1 = vadd.f32 %v3204_v35, %v788_v28  ;;  %v1244_v7 = vor.u32 %v1243_v62, %v1241_v37  ;;  %v4089_v10 = vshrl.u32 %v3361_v29, 16 }
 0x109   : > { %v3388_v48 = vpack.c.bf16 %v809_v43, %v809_v43  ;;  %v1242_v34 = vsel %vm3246_vm4, %v1240_v55, %v1241_v37  ;;  %v1271_v28 = vor.u32 %v1270_v2, %v3376_v63  ;;  %v4090_v23 = vshrl.u32 %v3366_v40, 16 }
 0x10a   : > { %894 = vrot.lane.b32.xlu1 %v3358_v26, %s3027_s13  ;;  %v813_v16 = vadd.f32 %v3204_v35, %v786_v57  ;;  %v1081_v20 = vshrl.u32 %v3368_v42, 16  ;;  %v3396_v17 = vpack.c.bf16 %v814_v54, %v814_v54  ;;  %v3400_v57 = vpack.c.bf16 %v812_v9, %v812_v9 }
 0x10b   : > { %1317 = vrot.lane.b32.xlu0 %v1242_v34, %s3028_s19  ;;  %v4094_v35 = vshll.u32 %v3388_v48, 16  ;;  %v3402_v43 = vpack.c.bf16 %v815_v1, %v815_v1  ;;  %v3408_v37 = vrot.slane %v4084_v32, 5  ;;  %v1245_v62 = vrot.slane %v1244_v7, 4 }
 0x10c   : > { %v3410_v55 = vpack.c.bf16 %v813_v16, %v813_v16  ;;  %v1261_v54 = vrot.slane %v1033_v4, 4  ;;  %v3414_v2 = vrot.slane %v4085_v6, 5  ;;  %v1272_v9 = vrot.slane %v1271_v28, 4 }
 0x10d   : > { %4109 = vst [vmem:[#allocation4_spill] sm:$0xff] %v3408_v37  ;;  %v1288_v1 = vrot.slane %v1081_v20, 4  ;;  %v1246_v34 = vrot.slane %v1009_v36, 4  ;;  %v1247_v39 = vrot.slane %v4088_v47, 5  ;;  %v3420_v32 = vrot.slane %v1033_v4, 7 }
 0x10e   : > { %906 = vrot.lane.b32.xlu1 %v3368_v42, %s3027_s13  ;;  %4110 = vst [vmem:[#allocation5_spill] sm:$0xff] %v3414_v2  ;;  %v3424_v16 = vrot.slane %v4089_v10, 7  ;;  %v4096_v6 = vshll.u32 %v3402_v43, 16  ;;  %v3431_v28 = vrot.slane %v4090_v23, 7  ;;  %v3433_v36 = vrot.slane %v1081_v20, 7 }
 0x10f   : > { %1319 = vrot.lane.b32.xlu0 %v1245_v62, %s3028_s19  ;;  %v1065_v5 = vshrl.u32 %v3388_v48, 16  ;;  %v4098_v4 = vshrl.u32 %v3396_v17, 16  ;;  %v1089_v59 = vshrl.u32 %v3400_v57, 16  ;;  %v1113_v7 = vshrl.u32 %v3402_v43, 16 }
 0x110   : > { %v1097_v47 = vshrl.u32 %v3410_v55, 16  ;;  %v1262_v62 = vor.u32 %v1261_v54, %v3408_v37  ;;  %v4099_v10 = vshll.u32 %v3400_v57, 16  ;;  %v1289_v23 = vor.u32 %v1288_v1, %v3414_v2 }
 0x111   : > { %v1248_v20 = vor.u32 %v1247_v39, %v1246_v34  ;;  %v3446_v15 = vrot.slane %v4094_v35, 5  ;;  %v3455_v33 = vrot.slane %v4096_v6, 5  ;;  %v3457_v54 = vrot.slane %v1113_v7, 4 }
 0x112   : > { %1331 = vrot.lane.b32.xlu1 %v1272_v9, %s3028_s19  ;;  %v3451_v9 = vrot.slane %v1065_v5, 4  ;;  %v1067_v61 = vrot.slane %v1065_v5, 7  ;;  %v3461_v39 = vrot.slane %v4098_v4, 7  ;;  %v3464_v34 = vrot.slane %v1089_v59, 7 }
 0x113   : > { %4111 = vst [vmem:[#allocation6_spill] sm:$0xff] %v3446_v15  ;;  %904 = vrot.lane.b32.xlu0 %v3361_v29, %s3027_s13  ;;  %v1115_v35 = vrot.slane %v1113_v7, 7  ;;  %v3468_v53 = vrot.slane %v1097_v47, 7  ;;  %v1263_v51 = vrot.slane %v1262_v62, 4  ;;  %v1291_v6 = vrot.slane %v1089_v59, 4 }
 0x114   : > { %v1290_v24 = vrot.slane %v1289_v23, 4  ;;  %v3470_v49 = vrot.slane %v1248_v20, 4  ;;  %v1292_v5 = vrot.slane %v4099_v10, 5  ;;  %v3477_v4 = vor.u32 %v980_v52, %v3267_v30 }
 0x115   : > { %v1280_v7 = vor.u32 %v3451_v9, %v3446_v15  ;;  %v4113_v23 = vshll.u32 %v3410_v55, 16  ;;  %v4114_v20 = vshll.u32 %v3214_v50, 16  ;;  %v3496_v44 = vrot.slane %v1097_v47, 4 }
 0x116   : > { %902 = vrot.lane.b32.xlu1 %v3388_v48, %s3027_s13  ;;  %4112 = vst [vmem:[#allocation7_spill] sm:$0xff] %v3477_v4  ;;  %v4116_v52 = vshrl.u32 %v3312_v18, 16  ;;  %v4117_v59 = vshll.u32 %v3312_v18, 16  ;;  %v1293_v4 = vor.u32 %v1292_v5, %v1291_v6  ;;  %v983_v50 = vrot.slane %v3267_v30, 4 }
 0x117   : > { %900 = vrot.lane.b32.xlu0 %v3366_v40, %s3027_s13  ;;  %v3487_v62 = vrot.slane %v4113_v23, 5  ;;  %v3492_v10 = vor.u32 %v4114_v20, %v3269_v31  ;;  %v4120_v47 = vshll.u32 %v3221_v56, 16  ;;  %v967_v15 = vrot.slane %v3269_v31, 4 }
 0x118   : > { %v3500_v9 = vrot.slane %v4116_v52, 4  ;;  %v1265_v1 = vrot.slane %v4117_v59, 5  ;;  %v4121_v52 = vshll.u32 %v3231_v0, 16  ;;  %v1251_v6 = vsel %vm3246_vm4, %v3470_v49, %v3321_v27 }
 0x119   : > { %4115 = vst [vmem:[#allocation8_spill] sm:$0xff] %v3492_v10  ;;  %v990_v20 = vor.u32 %v4120_v47, %v3275_v41  ;;  %v4122_v5 = vshrl.u32 %v3315_v22, 16  ;;  %v4123_v30 = vshll.u32 %v3315_v22, 16  ;;  %v3526_v37 = vrot.slane %v1293_v4, 4 }
 0x11a   : > { %914 = vrot.lane.b32.xlu1 %v3402_v43, %s3027_s13  ;;  %v974_v10 = vor.u32 %v4121_v52, %v3281_v46  ;;  %v4124_v56 = vshrl.u32 %v3361_v29, 16  ;;  %v4125_v46 = vshll.u32 %v3238_v8, 16  ;;  %v1015_v49 = vrot.slane %v3290_v58, 4 }
 0x11b   : > { %v1255_v59 = vrot.slane %v4122_v5, 4  ;;  %v1256_v2 = vrot.slane %v4123_v30, 5  ;;  %1327 = vrot.lane.b32.xlu0 %v1263_v51, %s3028_s19  ;;  %v3533_v31 = vsel %vm3506_vm7, %v983_v50, %v990_v20  ;;  %v1296_v51 = vsel %vm3246_vm4, %v3526_v37, %v3487_v62 }
 0x11c   : > { %v1282_v0 = vrot.slane %v4124_v56, 4  ;;  %v3537_v41 = vsel %vm3506_vm7, %v967_v15, %v974_v10  ;;  %v3542_v27 = vor.u32 %v4125_v46, %v3290_v58  ;;  %v4126_v4 = vshll.u32 %v3260_v25, 16 }
 0x11d   : > { %v4127_v15 = vshll.u32 %v3254_v19, 16  ;;  %v1266_v8 = vor.u32 %v1265_v1, %v3500_v9  ;;  %v4128_v47 = vshll.u32 %v3293_v60, 16  ;;  %v1047_v52 = vrot.slane %v3345_v13, 4 }
 0x11e   : > { %1339 = vrot.lane.b32.xlu1 %v1290_v24, %s3028_s19  ;;  %v1022_v50 = vor.u32 %v4126_v4, %v3305_v12  ;;  %v999_v24 = vrot.slane %v3303_v11, 4  ;;  %v4129_v25 = vshll.u32 %v3323_v38, 16  ;;  %v4130_v12 = vshll.u32 %v3312_v18, 16 }
 0x11f   : > { %v3556_v10 = vor.u32 %v4127_v15, %v3303_v11  ;;  %v1006_v20 = vor.u32 %v4128_v47, %v3328_v45  ;;  %v4131_v11 = vmov %v4123_v30  ;;  %912 = vrot.lane.b32.xlu0 %v3396_v17, %s3027_s13  ;;  %v1031_v38 = vrot.slane %v3355_v21, 4 }
 0x120   : > { %v3566_v58 = vsel %vm3506_vm7, %v1015_v49, %v1022_v50  ;;  %v1054_v19 = vor.u32 %v4129_v25, %v3378_v3  ;;  %v3574_v1 = vor.u32 %v4130_v12, %v3345_v13  ;;  %v3579_v60 = vor.u32 %v4131_v11, %v3355_v21 }
 0x121   : > { %v3585_v45 = vsel %vm3506_vm7, %v999_v24, %v1006_v20  ;;  %v4132_v3 = vshll.u32 %v3358_v26, 16  ;;  %v1079_v13 = vrot.slane %v3424_v16, 4  ;;  %v4133_v9 = vshll.u32 %v3368_v42, 16 }
 0x122   : > { %910 = vrot.lane.b32.xlu1 %v3410_v55, %s3027_s13  ;;  %v3596_v22 = vsel %vm3506_vm7, %v1047_v52, %v1054_v19  ;;  %v4134_v21 = vshll.u32 %v3361_v29, 16  ;;  %v1063_v26 = vrot.slane %v3431_v28, 4  ;;  %v4135_v56 = vshll.u32 %v3388_v48, 16 }
 0x123   : > { %v1038_v18 = vor.u32 %v4132_v3, %v3420_v32  ;;  %v1086_v5 = vor.u32 %v4133_v9, %v3433_v36  ;;  %v4136_v49 = vshll.u32 %v3366_v40, 16  ;;  %v1111_v42 = vrot.slane %v3461_v39, 4  ;;  %908 = vrot.lane.b32.xlu0 %v3400_v57, %s3027_s13 }
 0x124   : > { %v3604_v30 = vor.u32 %v4134_v21, %v3424_v16  ;;  %v1070_v46 = vor.u32 %v4135_v56, %v1067_v61  ;;  %v4137_v36 = vshll.u32 %v3402_v43, 16  ;;  %v4138_v15 = vshll.u32 %v3396_v17, 16  ;;  %v4149_v56 = vld [vmem:[#allocation6_spill] sm:$0xff] }
 0x125   : > { %v3609_v32 = vsel %vm3506_vm7, %v1031_v38, %v1038_v18  ;;  %v3616_v4 = vor.u32 %v4136_v49, %v3431_v28  ;;  %v3621_v16 = vsel %vm3506_vm7, %v1079_v13, %v1086_v5  ;;  %v1095_v61 = vrot.slane %v3464_v34, 4  ;;  %v4148_v5 = vld [vmem:[#allocation5_spill] sm:$0xff] }
 0x126   : > { %v1118_v50 = vor.u32 %v4137_v36, %v1115_v35  ;;  %v3628_v24 = vor.u32 %v4138_v15, %v3461_v39  ;;  %v4139_v48 = vmov %v4134_v21  ;;  %v3637_v47 = vsel %vm3506_vm7, %v1063_v26, %v1070_v46  ;;  %1321 = vrot.lane.b32.xlu1 %v1251_v6, %s3028_s19 }
 0x127   : > { %v1283_v28 = vrot.slane %v4139_v48, 5  ;;  %v4140_v35 = vshll.u32 %v3410_v55, 16  ;;  %v4141_v39 = vshll.u32 %v3400_v57, 16  ;;  %v1281_v29 = vrot.slane %v1280_v7, 4 }
 0x128   : > { %v3650_v52 = vsel %vm3506_vm7, %v1111_v42, %v1118_v50  ;;  %v1298_v25 = vor.u32 %v3496_v44, %v3487_v62  ;;  %v1257_v55 = vor.u32 %v1256_v2, %v1255_v59  ;;  %v4144_v12 = vmov %v4136_v49  ;;  %v4152_v62 = vld [vmem:[#allocation7_spill] sm:$0xff] }
 0x129   : > { %v1102_v43 = vor.u32 %v4140_v35, %v3468_v53  ;;  %v3645_v20 = vor.u32 %v4141_v39, %v3464_v34  ;;  %v4142_v53 = vor.u32 %v3457_v54, %v3455_v33  ;;  %v4143_v34 = vshrl.u32 %v3366_v40, 16  ;;  %1335 = vrot.lane.b32.xlu0 %v1281_v29, %s3028_s19 }
 0x12a   : > { %v1274_v11 = vrot.slane %v4144_v12, 5  ;;  %v1267_v7 = vrot.slane %v1266_v8, 4  ;;  %v1284_v38 = vor.u32 %v1283_v28, %v1282_v0  ;;  %v4145_v44 = vshrl.u32 %v3396_v17, 16  ;;  %v4147_v0 = vld [vmem:[#allocation4_spill] sm:$0xff] }
 0x12b   : > { %v3656_v19 = vsel %vm3506_vm7, %v1095_v61, %v1102_v43  ;;  %v1308_v57 = vrot.slane %v4142_v53, 4  ;;  %v1273_v6 = vrot.slane %v4143_v34, 4  ;;  %v4146_v3 = vmov %v4138_v15  ;;  %v4153_v15 = vld [vmem:[#allocation8_spill] sm:$0xff] }
 0x12c   : > { %v1300_v23 = vrot.slane %v4145_v44, 4  ;;  %v1301_v18 = vrot.slane %v4146_v3, 5  ;;  %v1299_v54 = vrot.slane %v1298_v25, 4  ;;  %v1258_v2 = vrot.slane %v1257_v55, 4 }
 0x12d   : > { %1347 = vrot.lane.b32.xlu1 %v1308_v57, %s3028_s19  ;;  %v1275_v59 = vor.u32 %v1274_v11, %v1273_v6  ;;  %v1269_v40 = vsel %vm3246_vm4, %v1267_v7, %v3376_v63  ;;  %v1285_v13 = vrot.slane %v1284_v38, 4 }
 0x12e   : > { %1343 = vrot.lane.b32.xlu0 %v1299_v54, %s3028_s19  ;;  %v1302_v8 = vor.u32 %v1301_v18, %v1300_v23  ;;  %v1260_v17 = vsel %vm3246_vm4, %v1258_v2, %v4147_v0 }
 0x12f   : > { %v1276_v9 = vrot.slane %v1275_v59, 4  ;;  %v1287_v21 = vsel %vm3246_vm4, %v1285_v13, %v4148_v5 }
 0x130   : > { %v1303_v26 = vrot.slane %v1302_v8, 4 }
 0x131   : > { %1329 = vrot.lane.b32.xlu1 %v1269_v40, %s3028_s19  ;;  %v1278_v63 = vsel %vm3246_vm4, %v1276_v9, %v4149_v56 }
 0x132   : > { %1325 = vrot.lane.b32.xlu0 %v1260_v17, %s3028_s19  ;;  %v1305_v46 = vsel %vm3246_vm4, %v1303_v26, %v3455_v33  ;;  %vm3752_vm4 = vmand %vm1412_vm3, %vm1413_vm2 }
 0x135   : > { %1337 = vrot.lane.b32.xlu1 %v1287_v21, %s3028_s19 }
 0x136   : > { %1333 = vrot.lane.b32.xlu0 %v1278_v63, %s3028_s19 }
 0x139   : > { %1345 = vrot.lane.b32.xlu1 %v1305_v46, %s3028_s19 }
 0x13a   : > { %1341 = vrot.lane.b32.xlu0 %v1296_v51, %s3028_s19 }
 0x15a   : > { %v881_v49 = vpop.permute.xlu1 %880 }
 0x15b   : > { %939 = vst.msk [vmem:[#allocation2 + $0x8] sm:$0xf] %vm936_vm8, %v881_v49 }
 0x15c   : > { %v877_v42 = vpop.permute.xlu0 %876 }
 0x15d   : > { %937 = vst.msk [vmem:[#allocation2] sm:$0xf] %vm936_vm8, %v877_v42 }
 0x15e   : > { %v883_v36 = vpop.permute.xlu1 %882 }
 0x15f   : > { %940 = vst.msk [vmem:[#allocation2 + $0xc] sm:$0xf] %vm936_vm8, %v883_v36 }
 0x160   : > { %1151 = vst.msk [vmem:[#allocation2 + $0xc] sm:$0xf] %vm1140_vm9, %v3533_v31 }
 0x161   : > { %v879_v14 = vpop.permute.xlu0 %878 }
 0x162   : > { %v1148_v37 = vld [vmem:[#allocation2 + $0x8] sm:$0xf]  ;;  %938 = vst.msk [vmem:[#allocation2 + $0x4] sm:$0xf] %vm936_vm8, %v879_v14 }
 0x163   : > { %v1149_v51 = vsel %vm3702_vm11, %v4152_v62, %v1148_v37  ;;  %1147 = vst.msk [vmem:[#allocation2 + $0x4] sm:$0xf] %vm1140_vm9, %v3537_v41 }
 0x164   : > { %1150 = vst [vmem:[#allocation2 + $0x8] sm:$0xf] %v1149_v51  ;;  %v1143_v50 = vld [vmem:[#allocation2] sm:$0xf]  ;;  %v1314_v31 = vpop.permute.xlu1 %1313 }
 0x165   : > { %v1144_v61 = vsel %vm3702_vm11, %v4153_v15, %v1143_v50  ;;  %v889_v48 = vpop.permute.xlu0 %888 }
 0x166   : > { %1145 = vst [vmem:[#allocation2] sm:$0xf] %v1144_v61  ;;  %943 = vst.msk [vmem:[#allocation2 + $0x18] sm:$0xf] %vm936_vm8, %v889_v48 }
 0x167   : > { %v1377_v34 = vld [vmem:[#allocation2 + $0xc] sm:$0xf] }
 0x168   : > { %v891_v39 = vpop.permute.xlu1 %890 }
 0x169   : > { %v885_v35 = vpop.permute.xlu0 %884  ;;  %944 = vst.msk [vmem:[#allocation2 + $0x1c] sm:$0xf] %vm936_vm8, %v891_v39 }
 0x16a   : > { %941 = vst.msk [vmem:[#allocation2 + $0x10] sm:$0xf] %vm936_vm8, %v885_v35  ;;  %v1373_v3 = vld [vmem:[#allocation2 + $0x4] sm:$0xf] }
 0x16b   : > { %v1189_v41 = vld [vmem:[#allocation2 + $0x8] sm:$0x1]  ;;  %1159 = vst.msk [vmem:[#allocation2 + $0x1c] sm:$0xf] %vm1140_vm9, %v3566_v58 }
 0x16c   : > { %v1190_v43 = vsel %vm3719_vm13, 0, %v1189_v41  ;;  %v1316_v6 = vpop.permute.xlu1 %1315 }
 0x16d   : > { %1191 = vst [vmem:[#allocation2 + $0x8] sm:$0x1] %v1190_v43  ;;  %v1186_v29 = vld [vmem:[#allocation2] sm:$0x1]  ;;  %v1156_v25 = vld [vmem:[#allocation2 + $0x18] sm:$0xf]  ;;  %v1378_v11 = vsel %vm3737_vm15, %v1316_v6, %v1377_v34  ;;  %v1310_v58 = vpop.permute.xlu0 %1309 }
 0x16e   : > { %v1187_v53 = vsel %vm3719_vm13, 0, %v1186_v29  ;;  %1376 = vst.msk [vmem:[#allocation2 + $0x8] sm:$0xf] %vm1369_vm14, %v1314_v31  ;;  %v1157_v57 = vsel %vm3702_vm11, %v3542_v27, %v1156_v25  ;;  %1379 = vst [vmem:[#allocation2 + $0xc] sm:$0xf] %v1378_v11 }
 0x16f   : > { %1188 = vst [vmem:[#allocation2] sm:$0x1] %v1187_v53  ;;  %1158 = vst [vmem:[#allocation2 + $0x18] sm:$0xf] %v1157_v57 }
 0x170   : > { %1370 = vst.msk [vmem:[#allocation2] sm:$0xf] %vm1369_vm14, %v1310_v58  ;;  %v887_v7 = vpop.permute.xlu1 %886 }
 0x171   : > { %v1152_v12 = vld [vmem:[#allocation2 + $0x10] sm:$0xf]  ;;  %942 = vst.msk [vmem:[#allocation2 + $0x14] sm:$0xf] %vm936_vm8, %v887_v7 }
 0x172   : > { %v1153_v27 = vsel %vm3702_vm11, %v3556_v10, %v1152_v12  ;;  %1155 = vst.msk [vmem:[#allocation2 + $0x14] sm:$0xf] %vm1140_vm9, %v3585_v45  ;;  %v1312_v10 = vpop.permute.xlu0 %1311  ;;  %v1385_v8 = vld [vmem:[#allocation2 + $0x1c] sm:$0xf] }
 0x173   : > { %1154 = vst [vmem:[#allocation2 + $0x10] sm:$0xf] %v1153_v27  ;;  %v1374_v18 = vsel %vm3737_vm15, %v1312_v10, %v1373_v3 }
 0x174   : > { %v899_v54 = vpop.permute.xlu1 %898  ;;  %1375 = vst [vmem:[#allocation2 + $0x4] sm:$0xf] %v1374_v18 }
 0x175   : > { %v1418_v2 = vld [vmem:[#allocation2 + $0xc] sm:$0x8]  ;;  %948 = vst.msk [vmem:[#allocation2 + $0x2c] sm:$0xf] %vm936_vm8, %v899_v54 }
 0x176   : > { %v1195_v38 = vld [vmem:[#allocation2 + $0x18] sm:$0x1]  ;;  %v1419_v45 = vsel %vm3752_vm4, 0, %v1418_v2  ;;  %1167 = vst.msk [vmem:[#allocation2 + $0x2c] sm:$0xf] %vm1140_vm9, %v3596_v22  ;;  %v897_v13 = vpop.permute.xlu0 %896 }
 0x177   : > { %v1196_v44 = vsel %vm3719_vm13, 0, %v1195_v38  ;;  %1420 = vst [vmem:[#allocation2 + $0xc] sm:$0x8] %v1419_v45  ;;  %947 = vst.msk [vmem:[#allocation2 + $0x28] sm:$0xf] %vm936_vm8, %v897_v13 }
 0x178   : > { %1197 = vst [vmem:[#allocation2 + $0x18] sm:$0x1] %v1196_v44  ;;  %v1324_v0 = vpop.permute.xlu1 %1323 }
 0x179   : > { %v1386_v17 = vsel %vm3737_vm15, %v1324_v0, %v1385_v8  ;;  %v1381_v36 = vld [vmem:[#allocation2 + $0x14] sm:$0xf] }
 0x17a   : > { %v1192_v59 = vld [vmem:[#allocation2 + $0x10] sm:$0x1]  ;;  %1387 = vst [vmem:[#allocation2 + $0x1c] sm:$0xf] %v1386_v17  ;;  %v893_v9 = vpop.permute.xlu0 %892 }
 0x17b   : > { %v1193_v40 = vsel %vm3719_vm13, 0, %v1192_v59  ;;  %v1415_v5 = vld [vmem:[#allocation2 + $0x4] sm:$0x8]  ;;  %945 = vst.msk [vmem:[#allocation2 + $0x20] sm:$0xf] %vm936_vm8, %v893_v9 }
 0x17c   : > { %1194 = vst [vmem:[#allocation2 + $0x10] sm:$0x1] %v1193_v40  ;;  %v895_v21 = vpop.permute.xlu1 %894  ;;  %v1416_v22 = vsel %vm3752_vm4, 0, %v1415_v5 }
 0x17d   : > { %946 = vst.msk [vmem:[#allocation2 + $0x24] sm:$0xf] %vm936_vm8, %v895_v21  ;;  %1417 = vst [vmem:[#allocation2 + $0x4] sm:$0x8] %v1416_v22  ;;  %v1393_v62 = vld [vmem:[#allocation2 + $0x2c] sm:$0xf] }
 0x17e   : > { %1163 = vst.msk [vmem:[#allocation2 + $0x24] sm:$0xf] %vm1140_vm9, %v3609_v32  ;;  %v1164_v26 = vld [vmem:[#allocation2 + $0x28] sm:$0xf]  ;;  %v1318_v56 = vpop.permute.xlu0 %1317 }
 0x17f   : > { %v1165_v63 = vsel %vm3702_vm11, %v3574_v1, %v1164_v26  ;;  %1380 = vst.msk [vmem:[#allocation2 + $0x10] sm:$0xf] %vm1369_vm14, %v1318_v56 }
 0x180   : > { %v907_v46 = vpop.permute.xlu1 %906  ;;  %1166 = vst [vmem:[#allocation2 + $0x28] sm:$0xf] %v1165_v63 }
 0x181   : > { %v1424_v49 = vld [vmem:[#allocation2 + $0x1c] sm:$0x8]  ;;  %952 = vst.msk [vmem:[#allocation2 + $0x3c] sm:$0xf] %vm936_vm8, %v907_v46 }
 0x182   : > { %v1425_v42 = vsel %vm3752_vm4, 0, %v1424_v49  ;;  %1175 = vst.msk [vmem:[#allocation2 + $0x3c] sm:$0xf] %vm1140_vm9, %v3621_v16  ;;  %v1160_v32 = vld [vmem:[#allocation2 + $0x20] sm:$0xf]  ;;  %v1320_v14 = vpop.permute.xlu0 %1319 }
 0x183   : > { %1426 = vst [vmem:[#allocation2 + $0x1c] sm:$0x8] %v1425_v42  ;;  %v1161_v1 = vsel %vm3702_vm11, %v3579_v60, %v1160_v32  ;;  %v1382_v37 = vsel %vm3737_vm15, %v1320_v14, %v1381_v36 }
 0x184   : > { %v1332_v51 = vpop.permute.xlu1 %1331  ;;  %1162 = vst [vmem:[#allocation2 + $0x20] sm:$0xf] %v1161_v1  ;;  %1383 = vst [vmem:[#allocation2 + $0x14] sm:$0xf] %v1382_v37 }
 0x185   : > { %v1394_v50 = vsel %vm3737_vm15, %v1332_v51, %v1393_v62  ;;  %v1389_v53 = vld [vmem:[#allocation2 + $0x24] sm:$0xf] }
 0x186   : > { %1395 = vst [vmem:[#allocation2 + $0x2c] sm:$0xf] %v1394_v50  ;;  %v905_v16 = vpop.permute.xlu0 %904 }
 0x187   : > { %v1201_v15 = vld [vmem:[#allocation2 + $0x28] sm:$0x1]  ;;  %951 = vst.msk [vmem:[#allocation2 + $0x38] sm:$0xf] %vm936_vm8, %v905_v16 }
 0x188   : > { %v903_v61 = vpop.permute.xlu1 %902  ;;  %v1202_v48 = vsel %vm3719_vm13, 0, %v1201_v15 }
 0x189   : > { %950 = vst.msk [vmem:[#allocation2 + $0x34] sm:$0xf] %vm936_vm8, %v903_v61  ;;  %1203 = vst [vmem:[#allocation2 + $0x28] sm:$0x1] %v1202_v48  ;;  %v1401_v12 = vld [vmem:[#allocation2 + $0x3c] sm:$0xf] }
 0x18a   : > { %1171 = vst.msk [vmem:[#allocation2 + $0x34] sm:$0xf] %vm1140_vm9, %v3637_v47  ;;  %v901_v60 = vpop.permute.xlu0 %900 }
 0x18b   : > { %v1198_v31 = vld [vmem:[#allocation2 + $0x20] sm:$0x1]  ;;  %v1421_v35 = vld [vmem:[#allocation2 + $0x14] sm:$0x8]  ;;  %949 = vst.msk [vmem:[#allocation2 + $0x30] sm:$0xf] %vm936_vm8, %v901_v60 }
 0x18c   : > { %v915_v41 = vpop.permute.xlu1 %914  ;;  %v1199_v43 = vsel %vm3719_vm13, 0, %v1198_v31  ;;  %v1422_v39 = vsel %vm3752_vm4, 0, %v1421_v35 }
 0x18d   : > { %v1430_v29 = vld [vmem:[#allocation2 + $0x2c] sm:$0x8]  ;;  %956 = vst.msk [vmem:[#allocation2 + $0x4c] sm:$0xf] %vm936_vm8, %v915_v41  ;;  %1200 = vst [vmem:[#allocation2 + $0x20] sm:$0x1] %v1199_v43 }
 0x18e   : > { %1423 = vst [vmem:[#allocation2 + $0x14] sm:$0x8] %v1422_v39  ;;  %v1431_v47 = vsel %vm3752_vm4, 0, %v1430_v29  ;;  %1183 = vst.msk [vmem:[#allocation2 + $0x4c] sm:$0xf] %vm1140_vm9, %v3650_v52  ;;  %v1328_v57 = vpop.permute.xlu0 %1327 }
 0x18f   : > { %1432 = vst [vmem:[#allocation2 + $0x2c] sm:$0x8] %v1431_v47  ;;  %v1172_v25 = vld [vmem:[#allocation2 + $0x38] sm:$0xf]  ;;  %v1390_v6 = vsel %vm3737_vm15, %v1328_v57, %v1389_v53 }
 0x190   : > { %v1173_v34 = vsel %vm3702_vm11, %v3604_v30, %v1172_v25  ;;  %v1340_v11 = vpop.permute.xlu1 %1339  ;;  %1391 = vst [vmem:[#allocation2 + $0x24] sm:$0xf] %v1390_v6 }
 0x191   : > { %1174 = vst [vmem:[#allocation2 + $0x38] sm:$0xf] %v1173_v34  ;;  %v1402_v27 = vsel %vm3737_vm15, %v1340_v11, %v1401_v12  ;;  %v1397_v59 = vld [vmem:[#allocation2 + $0x34] sm:$0xf] }
 0x192   : > { %1403 = vst [vmem:[#allocation2 + $0x3c] sm:$0xf] %v1402_v27  ;;  %v1168_v52 = vld [vmem:[#allocation2 + $0x30] sm:$0xf]  ;;  %v913_v58 = vpop.permute.xlu0 %912 }
 0x193   : > { %v1169_v7 = vsel %vm3702_vm11, %v3616_v4, %v1168_v52  ;;  %955 = vst.msk [vmem:[#allocation2 + $0x48] sm:$0xf] %vm936_vm8, %v913_v58 }
 0x194   : > { %v911_v30 = vpop.permute.xlu1 %910  ;;  %1170 = vst [vmem:[#allocation2 + $0x30] sm:$0xf] %v1169_v7 }
 0x195   : > { %954 = vst.msk [vmem:[#allocation2 + $0x44] sm:$0xf] %vm936_vm8, %v911_v30  ;;  %v1409_v0 = vld [vmem:[#allocation2 + $0x4c] sm:$0xf] }
 0x196   : > { %1179 = vst.msk [vmem:[#allocation2 + $0x44] sm:$0xf] %vm1140_vm9, %v3656_v19  ;;  %v909_v38 = vpop.permute.xlu0 %908 }
 0x197   : > { %v1427_v10 = vld [vmem:[#allocation2 + $0x24] sm:$0x8]  ;;  %953 = vst.msk [vmem:[#allocation2 + $0x40] sm:$0xf] %vm936_vm8, %v909_v38 }
 0x198   : > { %v1207_v44 = vld [vmem:[#allocation2 + $0x38] sm:$0x1]  ;;  %v1322_v3 = vpop.permute.xlu1 %1321  ;;  %v1428_v4 = vsel %vm3752_vm4, 0, %v1427_v10 }
 0x199   : > { %v1208_v18 = vsel %vm3719_vm13, 0, %v1207_v44  ;;  %v1436_v54 = vld [vmem:[#allocation2 + $0x3c] sm:$0x8]  ;;  %1384 = vst.msk [vmem:[#allocation2 + $0x18] sm:$0xf] %vm1369_vm14, %v1322_v3 }
 0x19a   : > { %1209 = vst [vmem:[#allocation2 + $0x38] sm:$0x1] %v1208_v18  ;;  %1429 = vst [vmem:[#allocation2 + $0x24] sm:$0x8] %v1428_v4  ;;  %v1437_v19 = vsel %vm3752_vm4, 0, %v1436_v54 }
 0x19b   : > { %1438 = vst [vmem:[#allocation2 + $0x3c] sm:$0x8] %v1437_v19  ;;  %v1180_v2 = vld [vmem:[#allocation2 + $0x48] sm:$0xf]  ;;  %v1336_v45 = vpop.permute.xlu0 %1335  ;;  %v1204_v40 = vld [vmem:[#allocation2 + $0x30] sm:$0x1] }
 0x19c   : > { %v1181_v13 = vsel %vm3702_vm11, %v3628_v24, %v1180_v2  ;;  %v1398_v8 = vsel %vm3737_vm15, %v1336_v45, %v1397_v59  ;;  %v1205_v9 = vsel %vm3719_vm13, 0, %v1204_v40 }
 0x19d   : > { %1182 = vst [vmem:[#allocation2 + $0x48] sm:$0xf] %v1181_v13  ;;  %1399 = vst [vmem:[#allocation2 + $0x34] sm:$0xf] %v1398_v8  ;;  %v1405_v21 = vld [vmem:[#allocation2 + $0x44] sm:$0xf] }
 0x19e   : > { %1206 = vst [vmem:[#allocation2 + $0x30] sm:$0x1] %v1205_v9  ;;  %v1176_v22 = vld [vmem:[#allocation2 + $0x40] sm:$0xf] }
 0x19f   : > { %v1348_v17 = vpop.permute.xlu1 %1347  ;;  %v1177_v24 = vsel %vm3702_vm11, %v3645_v20, %v1176_v22 }
 0x1a0   : > { %v1410_v5 = vsel %vm3737_vm15, %v1348_v17, %v1409_v0  ;;  %v1344_v26 = vpop.permute.xlu0 %1343  ;;  %1178 = vst [vmem:[#allocation2 + $0x40] sm:$0xf] %v1177_v24 }
 0x1a1   : > { %1411 = vst [vmem:[#allocation2 + $0x4c] sm:$0xf] %v1410_v5  ;;  %v1406_v56 = vsel %vm3737_vm15, %v1344_v26, %v1405_v21 }
 0x1a2   : > { %1407 = vst [vmem:[#allocation2 + $0x44] sm:$0xf] %v1406_v56 }
 0x1a3   : > { %v1330_v63 = vpop.permute.xlu1 %1329 }
 0x1a4   : > { %1392 = vst.msk [vmem:[#allocation2 + $0x28] sm:$0xf] %vm1369_vm14, %v1330_v63  ;;  %v1326_v46 = vpop.permute.xlu0 %1325  ;;  %v1213_v49 = vld [vmem:[#allocation2 + $0x48] sm:$0x1]  ;;  %v1433_v42 = vld [vmem:[#allocation2 + $0x34] sm:$0x8] }
 0x1a5   : > { %1388 = vst.msk [vmem:[#allocation2 + $0x20] sm:$0xf] %vm1369_vm14, %v1326_v46  ;;  %v1214_v36 = vsel %vm3719_vm13, 0, %v1213_v49  ;;  %v1434_v20 = vsel %vm3752_vm4, 0, %v1433_v42 }
 0x1a6   : > { %1215 = vst [vmem:[#allocation2 + $0x48] sm:$0x1] %v1214_v36  ;;  %1435 = vst [vmem:[#allocation2 + $0x34] sm:$0x8] %v1434_v20 }
 0x1a7   : > { %v1338_v32 = vpop.permute.xlu1 %1337  ;;  %v1210_v1 = vld [vmem:[#allocation2 + $0x40] sm:$0x1] }
 0x1a8   : > { %v1442_v33 = vld [vmem:[#allocation2 + $0x4c] sm:$0x8]  ;;  %1400 = vst.msk [vmem:[#allocation2 + $0x38] sm:$0xf] %vm1369_vm14, %v1338_v32  ;;  %v1334_v14 = vpop.permute.xlu0 %1333  ;;  %v1211_v51 = vsel %vm3719_vm13, 0, %v1210_v1 }
 0x1a9   : > { %v1443_v55 = vsel %vm3752_vm4, 0, %v1442_v33  ;;  %v1439_v37 = vld [vmem:[#allocation2 + $0x44] sm:$0x8]  ;;  %1396 = vst.msk [vmem:[#allocation2 + $0x30] sm:$0xf] %vm1369_vm14, %v1334_v14  ;;  %1448 = sbr.rel (%p2636_p10) target bundleno = 432 (0x1b0), region = 72 }
 0x1aa   : > { %1444 = vst [vmem:[#allocation2 + $0x4c] sm:$0x8] %v1443_v55  ;;  %v1440_v50 = vsel %vm3752_vm4, 0, %v1439_v37  ;;  %1212 = vst [vmem:[#allocation2 + $0x40] sm:$0x1] %v1211_v51 }
 0x1ab   : > { %v1346_v62 = vpop.permute.xlu1 %1345  ;;  %1441 = vst [vmem:[#allocation2 + $0x44] sm:$0x8] %v1440_v50 }
 0x1ac   : > { %1408 = vst.msk [vmem:[#allocation2 + $0x48] sm:$0xf] %vm1369_vm14, %v1346_v62  ;;  %v1342_v16 = vpop.permute.xlu0 %1341 }
 0x1ad   : > { %1404 = vst.msk [vmem:[#allocation2 + $0x40] sm:$0xf] %vm1369_vm14, %v1342_v16 }
 0x1ae   : > { %vm1449_vm5 = vcmask 93184   ;;  %v3029_v15 = vmov 0  }
 0x1af   : > { %1450 = vst.msk [vmem:[#allocation2] sm:$0xf] %vm1449_vm5, %v3029_v15  ;;  %1451 = vst.msk [vmem:[#allocation2 + $0x4] sm:$0xf] %vm1449_vm5, %v3029_v15 }
 0x1b0 PF: > { %p2637_p11 = scmp.ne.s32.totalorder %s3009_s21, 1 }
 0x1b2   : > { %1455 = sbr.rel (%p2637_p11) target bundleno = 441 (0x1b9), region = 76 }
 0x1b7   : > { %vm1457_vm6 = vcmask 93184   ;;  %v3030_v28 = vmov 0  }
 0x1b8   : > { %1458 = vst.msk [vmem:[#allocation2 + $0x48] sm:$0xf] %vm1457_vm6, %v3030_v28  ;;  %1459 = vst.msk [vmem:[#allocation2 + $0x4c] sm:$0xf] %vm1457_vm6, %v3030_v28 }
 0x1b9 PF: > { %v2960_v23 = vld [vmem:[%s4075_s6 + $0x8] sm:$0x3f]   ;;  %vm1568_vm7 = vcmask 1045504   ;;  %vm1543_vm8 = vcmask 97280   ;;  %v2962_v60 = vld [vmem:[#allocation2 + $0x10] sm:$0xff]   ;;  %v2964_v35 = vld [vmem:[#allocation2 + $0x18] sm:$0xff]  }
 0x1ba   : > { %v2961_v61 = vld [vmem:[#allocation2 + $0x8] sm:$0xff]   ;;  %2911 = vmatprep.subr.msk.bf16.mxu1 %vm1568_vm7, %v2960_v23  ;;  %v1570_v48 = vsel %vm1568_vm7, %v2960_v23, 0  ;;  %v2963_v31 = vld [vmem:[%s4075_s6] sm:$0x3f]   ;;  %v2970_v29 = vld [vmem:[%s4075_s6 + $0x10] sm:$0x3f]  }
 0x1bb   : > { %2821 = vmatpush3.bf16.msra.mxu1 %v1570_v48  ;;  %2822 = vmatprep.mubr.msk.bf16.mxu1 %vm1543_vm8, %v2961_v61  ;;  %v1739_v41 = vsel %vm1568_vm7, %v2963_v31, 0  ;;  %v2965_v43 = vld [vmem:[#allocation2 + $0x20] sm:$0xff]   ;;  %v2966_v39 = vld [vmem:[#allocation2 + $0x28] sm:$0xff]   ;;  %v2971_v47 = vld [vmem:[#allocation2 + $0x10] sm:$0xff]   ;;  %v1928_v25 = vsel %vm1568_vm7, %v2970_v29, 0 }
 0x1bc   : > { %2912 = vmatprep.subr.msk.bf16.mxu1 %vm1568_vm7, %v2963_v31  ;;  %2913 = vmatprep.subr.msk.bf16.mxu0 %vm1568_vm7, %v2970_v29  ;;  %v2972_v53 = vld [vmem:[#allocation2 + $0x18] sm:$0xff]   ;;  %v2975_v57 = vld [vmem:[#allocation2 + $0x20] sm:$0xff]   ;;  %v2967_v34 = vld [vmem:[#allocation2 + $0x30] sm:$0xff]  }
 0x1bd   : > { %2857 = vmatpush3.bf16.msra.mxu0 %v1928_v25  ;;  %2858 = vmatprep.mubr.msk.bf16.mxu0 %vm1543_vm8, %v2971_v47  ;;  %v2968_v6 = vld [vmem:[#allocation2 + $0x38] sm:$0xff]   ;;  %v2976_v12 = vld [vmem:[#allocation2 + $0x28] sm:$0xff]   ;;  %v2979_v11 = vld [vmem:[#allocation2 + $0x30] sm:$0xff]  }
 0x1be   : > { %2823 = vmatmul.mubr.msk.bf16.vlgmr.msra.gmra.mxu1 %vm1543_vm8, %v2962_v60  ;;  %v2969_v27 = vld [vmem:[#allocation2 + $0x40] sm:$0xff]   ;;  %v2980_v58 = vld [vmem:[#allocation2 + $0x38] sm:$0xff]   ;;  %v2974_v30 = vld [vmem:[#allocation2 + $0x8] sm:$0xff]  }
 0x1bf   : > { %2839 = vmatpush3.bf16.msra.mxu1 %v1739_v41  ;;  %2826 = vmatprep.mubr.msk.bf16.mxu1 %vm1543_vm8, %v2964_v35  ;;  %v2973_v52 = vld [vmem:[#allocation2] sm:$0xff]   ;;  %v2977_v38 = vld [vmem:[#allocation2 + $0x10] sm:$0xff]   ;;  %v2984_v44 = vld [vmem:[#allocation2 + $0x48] sm:$0xff]  }
 0x1c0   : > { %2859 = vmatmul.mubr.msk.bf16.vlgmr.msra.gmra.mxu0 %vm1543_vm8, %v2972_v53  ;;  %v2983_v7 = vld [vmem:[#allocation2 + $0x40] sm:$0xff]   ;;  %v2978_v10 = vld [vmem:[#allocation2 + $0x18] sm:$0xff]   ;;  %v2982_v18 = vld [vmem:[#allocation2 + $0x28] sm:$0xff]  }
 0x1c1   : > { %2862 = vmatprep.mubr.msk.bf16.mxu0 %vm1543_vm8, %v2975_v57  ;;  %v2981_v3 = vld [vmem:[#allocation2 + $0x20] sm:$0xff]   ;;  %v2985_v4 = vld [vmem:[#allocation2 + $0x30] sm:$0xff]   ;;  %v2986_v54 = vld [vmem:[#allocation2 + $0x38] sm:$0xff]  }
 0x1c2   : > { %v2090_v19 = vld [vmem:[%s4077_s8] sm:$0x3]  ;;  %v2239_v13 = vld [vmem:[%s3150_s27 + $0x8] sm:$0xff]  ;;  %v2240_v0 = vld [vmem:[%s3150_s27 + $0x10] sm:$0xff] }
 0x1c3   : > { %v2123_v2 = vsel %vm652_vm0, %v2090_v19, 0  ;;  %2914 = vmatprep.subr.msk.bf16.mxu1 %vm652_vm0, %v2090_v19  ;;  %v2262_v59 = vld [vmem:[%s4079_s10] sm:$0x3]  ;;  %v2241_v17 = vld [vmem:[%s3150_s27 + $0x18] sm:$0xff]  ;;  %v2243_v21 = vld [vmem:[%s3150_s27 + $0x28] sm:$0xff] }
 0x1c4   : > { %v2295_v45 = vsel %vm652_vm0, %v2262_v59, 0  ;;  %2915 = vmatprep.subr.msk.bf16.mxu0 %vm652_vm0, %v2262_v59  ;;  %v2238_v40 = vld [vmem:[%s3150_s27] sm:$0xff]  ;;  %v2255_v9 = vpack.c.bf16 %v2241_v17, %v2240_v0  ;;  %v2244_v26 = vld [vmem:[%s3150_s27 + $0x30] sm:$0xff]  ;;  %v2245_v24 = vld [vmem:[%s3150_s27 + $0x38] sm:$0xff]  ;;  %vm2410_vm0 = vcmask 64512  }
 0x1c5   : > { %2893 = vmatpush3.bf16.msra.mxu0 %v2295_v45  ;;  %v2254_v8 = vpack.c.bf16 %v2239_v13, %v2238_v40  ;;  %v2242_v5 = vld [vmem:[%s3150_s27 + $0x20] sm:$0xff]  ;;  %v2257_v56 = vpack.c.bf16 %v2245_v24, %v2244_v26  ;;  %v2247_v46 = vld [vmem:[%s3150_s27 + $0x48] sm:$0xff]  ;;  %v2248_v42 = vld [vmem:[%s3150_s27 + $0x50] sm:$0xff] }
 0x1c6   : > { %2827 = vmatmul.mubr.msk.bf16.gmra.mxu1 %vm1543_vm8, %v2965_v43  ;;  %v2256_v22 = vpack.c.bf16 %v2243_v21, %v2242_v5  ;;  %v2246_v63 = vld [vmem:[%s3150_s27 + $0x40] sm:$0xff]  ;;  %v2249_v32 = vld [vmem:[%s3150_s27 + $0x58] sm:$0xff]  ;;  %v2251_v33 = vld [vmem:[%s3150_s27 + $0x68] sm:$0xff] }
 0x1c7   : > { %2830 = vmatprep.mubr.msk.bf16.mxu1 %vm1543_vm8, %v2966_v39  ;;  %v2258_v49 = vpack.c.bf16 %v2247_v46, %v2246_v63  ;;  %v2259_v36 = vpack.c.bf16 %v2249_v32, %v2248_v42  ;;  %v2250_v20 = vld [vmem:[%s3150_s27 + $0x60] sm:$0xff]  ;;  %v2252_v14 = vld [vmem:[%s3150_s27 + $0x70] sm:$0xff]  ;;  %v2253_v1 = vld [vmem:[%s3150_s27 + $0x78] sm:$0xff] }
 0x1c8   : > { %2863 = vmatmul.mubr.msk.bf16.gmra.mxu0 %vm1543_vm8, %v2976_v12  ;;  %v2260_v55 = vpack.c.bf16 %v2251_v33, %v2250_v20  ;;  %v2261_v37 = vpack.c.bf16 %v2253_v1, %v2252_v14 }
 0x1c9   : > { %2866 = vmatprep.mubr.msk.bf16.mxu0 %vm1543_vm8, %v2979_v11 }
 0x1ce   : > { %2831 = vmatmul.mubr.msk.bf16.gmra.mxu1 %vm1543_vm8, %v2967_v34 }
 0x1cf   : > { %2834 = vmatprep.mubr.msk.bf16.mxu1 %vm1543_vm8, %v2968_v6 }
 0x1d0   : > { %2867 = vmatmul.mubr.msk.bf16.gmra.mxu0 %vm1543_vm8, %v2980_v58 }
 0x1d1   : > { %2870 = vmatprep.mubr.msk.bf16.mxu0 %vm1543_vm8, %v2983_v7 }
 0x1d6   : > { %2835 = vmatmul.mubr.msk.bf16.gmra.mxu1 %vm1543_vm8, %v2969_v27 }
 0x1d7   : > { %2840 = vmatprep.mubr.msk.bf16.mxu1 %vm1543_vm8, %v2973_v52 }
 0x1d8   : > { %2871 = vmatmul.mubr.msk.bf16.gmra.mxu0 %vm1543_vm8, %v2984_v44 }
 0x1d9   : > { %2894 = vmatprep.mubr.msk.bf16.mxu0 %vm621_vm1, %v2254_v8 }
 0x1de   : > { %2841 = vmatmul.mubr.msk.bf16.vlgmr.msra.gmra.mxu1 %vm1543_vm8, %v2974_v30 }
 0x1df   : > { %2844 = vmatprep.mubr.msk.bf16.mxu1 %vm1543_vm8, %v2977_v38  ;;  %2875 = vmatpush3.bf16.msra.mxu1 %v2123_v2 }
 0x1e0   : > { %2895 = vmatmul.mubr.msk.bf16.vlgmr.msra.gmra.mxu0 %vm621_vm1, %v2255_v9 }
 0x1e1   : > { %2898 = vmatprep.mubr.msk.bf16.mxu0 %vm621_vm1, %v2256_v22 }
 0x1e6   : > { %2845 = vmatmul.mubr.msk.bf16.gmra.mxu1 %vm1543_vm8, %v2978_v10 }
 0x1e7   : > { %2848 = vmatprep.mubr.msk.bf16.mxu1 %vm1543_vm8, %v2981_v3 }
 0x1e8   : > { %2899 = vmatmul.mubr.msk.bf16.gmra.mxu0 %vm621_vm1, %v2257_v56 }
 0x1e9   : > { %2902 = vmatprep.mubr.msk.bf16.mxu0 %vm621_vm1, %v2258_v49 }
 0x1ee   : > { %2849 = vmatmul.mubr.msk.bf16.gmra.mxu1 %vm1543_vm8, %v2982_v18 }
 0x1ef   : > { %2852 = vmatprep.mubr.msk.bf16.mxu1 %vm1543_vm8, %v2985_v4  ;;  %v3948_v4 = vld [vmem:[%s4076_s7] ss:$0 sm:$0xff] }
 0x1f0   : > { %2903 = vmatmul.mubr.msk.bf16.gmra.mxu0 %vm621_vm1, %v2259_v36 }
 0x1f1   : > { %2906 = vmatprep.mubr.msk.bf16.mxu0 %vm621_vm1, %v2260_v55 }
 0x1f6   : > { %2853 = vmatmul.mubr.msk.bf16.gmra.mxu1 %vm1543_vm8, %v2986_v54 }
 0x1f8   : > { %2907 = vmatmul.mubr.msk.bf16.gmra.mxu0 %vm621_vm1, %v2261_v37 }
 0x27e   : > { %v2824_v62 = vpop.f32.mrf.mxu1 }
 0x280   : > { %v1606_v51 = vpop.f32.mrf.mxu1  ;;  %v2860_v23 = vpop.f32.mrf.mxu0 }
 0x282   : > { %v2825_v50 = vpop.f32.mrf.mxu1  ;;  %v1964_v48 = vpop.f32.mrf.mxu0 }
 0x284   : > { %v1609_v16 = vpop.f32.mrf.mxu1  ;;  %v2861_v31 = vpop.f32.mrf.mxu0 }
 0x286   : > { %v2828_v15 = vpop.f32.mrf.mxu1  ;;  %v1967_v41 = vpop.f32.mrf.mxu0 }
 0x288   : > { %v1622_v28 = vpop.f32.mrf.mxu1  ;;  %v2864_v29 = vpop.f32.mrf.mxu0 }
 0x28a   : > { %v2829_v61 = vpop.f32.mrf.mxu1  ;;  %v1980_v53 = vpop.f32.mrf.mxu0 }
 0x28c   : > { %v1625_v60 = vpop.f32.mrf.mxu1  ;;  %v2865_v6 = vpop.f32.mrf.mxu0 }
 0x28e   : > { %v2832_v35 = vpop.f32.mrf.mxu1  ;;  %v1983_v27 = vpop.f32.mrf.mxu0 }
 0x290   : > { %v1638_v43 = vpop.f32.mrf.mxu1  ;;  %v2868_v38 = vpop.f32.mrf.mxu0 }
 0x292   : > { %v3933_v39 = vpop.f32.mrf.mxu1  ;;  %v1996_v59 = vpop.f32.mrf.mxu0 }
 0x294   : > { %v3935_v47 = vpop.f32.mrf.mxu1  ;;  %v2869_v26 = vpop.f32.mrf.mxu0 }
 0x296   : > { %v3937_v25 = vpop.f32.mrf.mxu1  ;;  %v1999_v1 = vpop.f32.mrf.mxu0 }
 0x298   : > { %v3939_v57 = vpop.f32.mrf.mxu1 }
 0x29a   : > { %v3941_v34 = vpop.f32.mrf.mxu1 }
 0x29c   : > { %v3943_v12 = vpop.f32.mrf.mxu1 }
 0x29e   : > { %v2842_v11 = vpop.f32.mrf.mxu1 }
 0x29f   : > { %v1784_v52 = vadd.f32 %v2842_v11, %v2824_v62 }
 0x2a0   : > { %v1775_v58 = vpop.f32.mrf.mxu1 }
 0x2a1   : > { %v1776_v7 = vadd.f32 %v1775_v58, %v1606_v51  ;;  %v2029_v3 = vadd.f32 %v2860_v23, %v1784_v52 }
 0x2a2   : > { %v2843_v30 = vpop.f32.mrf.mxu1 }
 0x2a3   : > { %v2027_v44 = vadd.f32 %v1964_v48, %v1776_v7  ;;  %v1787_v10 = vadd.f32 %v2843_v30, %v2825_v50  ;;  %v2052_v8 = vadd.f32 %v3948_v4, %v2029_v3  ;;  %v2872_v48 = vpop.f32.mrf.mxu0 }
 0x2a4   : > { %v1778_v18 = vpop.f32.mrf.mxu1 }
 0x2a5   : > { %v2030_v54 = vadd.f32 %v2861_v31, %v1787_v10  ;;  %v1779_v19 = vadd.f32 %v1778_v18, %v1609_v16  ;;  %v2050_v45 = vadd.f32 %v3948_v4, %v2027_v44  ;;  %v2068_v63 = vmax.f32 %v2052_v8, 0.0  ;;  %v2012_v7 = vpop.f32.mrf.mxu0 }
 0x2a6   : > { %v2846_v2 = vpop.f32.mrf.mxu1 }
 0x2a7   : > { %v2053_v40 = vadd.f32 %v3948_v4, %v2030_v54  ;;  %v2028_v13 = vadd.f32 %v1967_v41, %v1779_v19  ;;  %v1800_v9 = vadd.f32 %v2846_v2, %v2828_v15  ;;  %v2066_v24 = vmax.f32 %v2050_v45, 0.0  ;;  %v2873_v19 = vpop.f32.mrf.mxu0 }
 0x2a8   : > { %v1791_v0 = vpop.f32.mrf.mxu1 }
 0x2a9   : > { %v2051_v17 = vadd.f32 %v3948_v4, %v2028_v13  ;;  %v1792_v5 = vadd.f32 %v1791_v0, %v1622_v28  ;;  %v2069_v21 = vmax.f32 %v2053_v40, 0.0  ;;  %v2033_v32 = vadd.f32 %v2864_v29, %v1800_v9 }
 0x2aa   : > { %v2847_v22 = vpop.f32.mrf.mxu1 }
 0x2ab   : > { %v2067_v56 = vmax.f32 %v2051_v17, 0.0  ;;  %v2031_v46 = vadd.f32 %v1980_v53, %v1792_v5  ;;  %v1803_v49 = vadd.f32 %v2847_v22, %v2829_v61  ;;  %v2083_v33 = vpack.c.bf16 %v2069_v21, %v2068_v63  ;;  %v2015_v22 = vpop.f32.mrf.mxu0 }
 0x2ac   : > { %v1794_v42 = vpop.f32.mrf.mxu1  ;;  %v2056_v16 = vadd.f32 %v3948_v4, %v2033_v32 }
 0x2ad   : > { %v1795_v36 = vadd.f32 %v1794_v42, %v1625_v60  ;;  %v2082_v20 = vpack.c.bf16 %v2067_v56, %v2066_v24  ;;  %v2034_v55 = vadd.f32 %v2865_v6, %v1803_v49  ;;  %v2054_v62 = vadd.f32 %v3948_v4, %v2031_v46 }
 0x2ae   : > { %v2850_v14 = vpop.f32.mrf.mxu1  ;;  %v2072_v11 = vmax.f32 %v2056_v16, 0.0 }
 0x2af   : > { %v2032_v37 = vadd.f32 %v1983_v27, %v1795_v36  ;;  %2876 = vmatprep.mubr.msk.bf16.mxu1 %vm621_vm1, %v2082_v20  ;;  %v2057_v51 = vadd.f32 %v3948_v4, %v2034_v55  ;;  %v1816_v28 = vadd.f32 %v2850_v14, %v2832_v35  ;;  %v2070_v29 = vmax.f32 %v2054_v62, 0.0  ;;  %v2896_v20 = vpop.f32.mrf.mxu0 }
 0x2b0   : > { %v1807_v50 = vpop.f32.mrf.mxu1  ;;  %2877 = vmatmul.mubr.msk.bf16.vlgmr.msra.gmra.mxu1 %vm621_vm1, %v2083_v33 }
 0x2b1   : > { %v2055_v15 = vadd.f32 %v3948_v4, %v2032_v37  ;;  %v1808_v23 = vadd.f32 %v1807_v50, %v1638_v43  ;;  %v2073_v60 = vmax.f32 %v2057_v51, 0.0  ;;  %v2037_v27 = vadd.f32 %v2868_v38, %v1816_v28  ;;  %v2331_v33 = vpop.f32.mrf.mxu0  ;;  %v3988_v51 = vld [vmem:[%s4078_s9] ss:$0 sm:$0xff] }
 0x2b2   : > { %v2851_v61 = vpop.f32.mrf.mxu1 }
 0x2b3   : > { %v2071_v31 = vmax.f32 %v2055_v15, 0.0  ;;  %v1819_v41 = vadd.f32 %v2851_v61, %v3933_v39  ;;  %v2035_v53 = vadd.f32 %v1996_v59, %v1808_v23  ;;  %v2085_v10 = vpack.c.bf16 %v2073_v60, %v2072_v11  ;;  %v2897_v55 = vpop.f32.mrf.mxu0 }
 0x2b4   : > { %v1810_v6 = vpop.f32.mrf.mxu1  ;;  %v2060_v18 = vadd.f32 %v3948_v4, %v2037_v27 }
 0x2b5   : > { %v2038_v52 = vadd.f32 %v2869_v26, %v1819_v41  ;;  %v1811_v58 = vadd.f32 %v1810_v6, %v3935_v47  ;;  %v2084_v44 = vpack.c.bf16 %v2071_v31, %v2070_v29  ;;  %v2058_v3 = vadd.f32 %v3948_v4, %v2035_v53  ;;  %v2334_v14 = vpop.f32.mrf.mxu0 }
 0x2b6   : > { %v2854_v30 = vpop.f32.mrf.mxu1  ;;  %v2076_v17 = vmax.f32 %v2060_v18, 0.0 }
 0x2b7   : > { %v2061_v35 = vadd.f32 %v3948_v4, %v2038_v52  ;;  %v2036_v43 = vadd.f32 %v1999_v1, %v1811_v58  ;;  %2880 = vmatprep.mubr.msk.bf16.mxu1 %vm621_vm1, %v2084_v44  ;;  %v1832_v38 = vadd.f32 %v2854_v30, %v3937_v25  ;;  %v2074_v8 = vmax.f32 %v2058_v3, 0.0  ;;  %v2900_v1 = vpop.f32.mrf.mxu0 }
 0x2b8   : > { %v1823_v39 = vpop.f32.mrf.mxu1  ;;  %2881 = vmatmul.mubr.msk.bf16.gmra.mxu1 %vm621_vm1, %v2085_v10 }
 0x2b9   : > { %v2059_v54 = vadd.f32 %v3948_v4, %v2036_v43  ;;  %v1824_v47 = vadd.f32 %v1823_v39, %v3939_v57  ;;  %v2077_v59 = vmax.f32 %v2061_v35, 0.0  ;;  %v2041_v9 = vadd.f32 %v2872_v48, %v1832_v38  ;;  %v2347_v37 = vpop.f32.mrf.mxu0 }
 0x2ba   : > { %v2855_v2 = vpop.f32.mrf.mxu1 }
 0x2bb   : > { %v2075_v45 = vmax.f32 %v2059_v54, 0.0  ;;  %v2039_v40 = vadd.f32 %v2012_v7, %v1824_v47  ;;  %v1835_v13 = vadd.f32 %v2855_v2, %v3941_v34  ;;  %v2087_v56 = vpack.c.bf16 %v2077_v59, %v2076_v17  ;;  %v2901_v62 = vpop.f32.mrf.mxu0 }
 0x2bc   : > { %v1826_v0 = vpop.f32.mrf.mxu1  ;;  %v2064_v63 = vadd.f32 %v3948_v4, %v2041_v9 }
 0x2bd   : > { %v2042_v5 = vadd.f32 %v2873_v19, %v1835_v13  ;;  %v1827_v21 = vadd.f32 %v1826_v0, %v3943_v12  ;;  %v2086_v25 = vpack.c.bf16 %v2075_v45, %v2074_v8  ;;  %v2062_v57 = vadd.f32 %v3948_v4, %v2039_v40  ;;  %v2350_v50 = vpop.f32.mrf.mxu0 }
 0x2be   : > { %v2080_v12 = vmax.f32 %v2064_v63, 0.0 }
 0x2bf   : > { %v2065_v26 = vadd.f32 %v3948_v4, %v2042_v5  ;;  %v2040_v24 = vadd.f32 %v2015_v22, %v1827_v21  ;;  %2884 = vmatprep.mubr.msk.bf16.mxu1 %vm621_vm1, %v2086_v25  ;;  %v2078_v46 = vmax.f32 %v2062_v57, 0.0  ;;  %v2904_v60 = vpop.f32.mrf.mxu0 }
 0x2c0   : > { %2885 = vmatmul.mubr.msk.bf16.gmra.mxu1 %vm621_vm1, %v2087_v56 }
 0x2c1   : > { %v2063_v34 = vadd.f32 %v3948_v4, %v2040_v24  ;;  %v2081_v49 = vmax.f32 %v2065_v26, 0.0  ;;  %v3983_v4 = vld [vmem:[%s4080_s11] ss:$0 sm:$0xff]  ;;  %v2363_v30 = vpop.f32.mrf.mxu0 }
 0x2c2   : > { %v2340_v15 = vadd.f32 %v2896_v20, %v3983_v4  ;;  %v2332_v41 = vadd.f32 %v3983_v4, %v2331_v33  ;;  %v2343_v27 = vadd.f32 %v2897_v55, %v3983_v4  ;;  %v2335_v44 = vadd.f32 %v3983_v4, %v2334_v14 }
 0x2c3   : > { %v2079_v42 = vmax.f32 %v2063_v34, 0.0  ;;  %v2089_v36 = vpack.c.bf16 %v2081_v49, %v2080_v12  ;;  %v2356_v3 = vadd.f32 %v2900_v1, %v3983_v4  ;;  %v2905_v38 = vpop.f32.mrf.mxu0  ;;  %v2348_v59 = vadd.f32 %v3983_v4, %v2347_v37 }
 0x2c4   : > { %v2359_v17 = vadd.f32 %v2901_v62, %v3983_v4  ;;  %v2351_v22 = vadd.f32 %v3983_v4, %v2350_v50  ;;  %v2372_v26 = vadd.f32 %v2904_v60, %v3983_v4  ;;  %v2375_v1 = vadd.f32 %v2905_v38, %v3983_v4 }
 0x2c5   : > { %v2088_v32 = vpack.c.bf16 %v2079_v42, %v2078_v46  ;;  %v2366_v0 = vpop.f32.mrf.mxu0 }
 0x2c7   : > { %2888 = vmatprep.mubr.msk.bf16.mxu1 %vm621_vm1, %v2088_v32  ;;  %v2908_v34 = vpop.f32.mrf.mxu0  ;;  %v2364_v32 = vadd.f32 %v3983_v4, %v2363_v30 }
 0x2c8   : > { %2889 = vmatmul.mubr.msk.bf16.gmra.mxu1 %vm621_vm1, %v2089_v36 }
 0x2c9   : > { %v2379_v14 = vpop.f32.mrf.mxu0 }
 0x2cb   : > { %v2909_v60 = vpop.f32.mrf.mxu0 }
 0x370   : > { %v2878_v16 = vpop.f32.mrf.mxu1 }
 0x371   : > { %v2168_v28 = vadd.f32 %v2878_v16, %v3988_v51  ;;  %v2367_v16 = vadd.f32 %v3983_v4, %v2366_v0 }
 0x372   : > { %v2159_v23 = vpop.f32.mrf.mxu1 }
 0x373   : > { %v2224_v61 = vmax.f32 %v2168_v28, 0.0  ;;  %v2160_v48 = vadd.f32 %v3988_v51, %v2159_v23  ;;  %v2388_v23 = vadd.f32 %v2908_v34, %v3983_v4 }
 0x374   : > { %v2879_v31 = vpop.f32.mrf.mxu1 }
 0x375   : > { %v2396_v29 = vadd.f32 %v2340_v15, %v2224_v61  ;;  %v2222_v53 = vmax.f32 %v2160_v48, 0.0  ;;  %v2171_v6 = vadd.f32 %v2879_v31, %v3988_v51 }
 0x376   : > { %v2162_v11 = vpop.f32.mrf.mxu1 }
 0x377   : > { %2413 = vst.msk [vmem:[%s3145_s28 + $0x10] sm:$0xff] %vm2410_vm0, %v2396_v29  ;;  %v2394_v52 = vadd.f32 %v2332_v41, %v2222_v53  ;;  %v2225_v58 = vmax.f32 %v2171_v6, 0.0  ;;  %v2163_v7 = vadd.f32 %v3988_v51, %v2162_v11  ;;  %v2380_v11 = vadd.f32 %v3983_v4, %v2379_v14 }
 0x378   : > { %v2882_v10 = vpop.f32.mrf.mxu1 }
 0x379   : > { %2411 = vst.msk [vmem:[%s3145_s28] sm:$0xff] %vm2410_vm0, %v2394_v52  ;;  %v2397_v35 = vadd.f32 %v2343_v27, %v2225_v58  ;;  %v2223_v43 = vmax.f32 %v2163_v7, 0.0  ;;  %v2184_v39 = vadd.f32 %v2882_v10, %v3988_v51  ;;  %v2382_v7 = vpop.f32.mrf.mxu0 }
 0x37a   : > { %v2175_v54 = vpop.f32.mrf.mxu1 }
 0x37b   : > { %2414 = vst.msk [vmem:[%s3145_s28 + $0x18] sm:$0xff] %vm2410_vm0, %v2397_v35  ;;  %v2395_v18 = vadd.f32 %v2335_v44, %v2223_v43  ;;  %v2228_v47 = vmax.f32 %v2184_v39, 0.0  ;;  %v2176_v19 = vadd.f32 %v3988_v51, %v2175_v54  ;;  %v2391_v44 = vadd.f32 %v2909_v60, %v3983_v4 }
 0x37c   : > { %v2883_v2 = vpop.f32.mrf.mxu1 }
 0x37d   : > { %2412 = vst.msk [vmem:[%s3145_s28 + $0x8] sm:$0xff] %vm2410_vm0, %v2395_v18  ;;  %v2400_v45 = vadd.f32 %v2356_v3, %v2228_v47  ;;  %v2226_v40 = vmax.f32 %v2176_v19, 0.0  ;;  %v2187_v13 = vadd.f32 %v2883_v2, %v3988_v51  ;;  %v2383_v3 = vadd.f32 %v3983_v4, %v2382_v7 }
 0x37e   : > { %v2178_v8 = vpop.f32.mrf.mxu1 }
 0x37f   : > { %2417 = vst.msk [vmem:[%s3145_s28 + $0x30] sm:$0xff] %vm2410_vm0, %v2400_v45  ;;  %v2398_v9 = vadd.f32 %v2348_v59, %v2226_v40  ;;  %v2229_v5 = vmax.f32 %v2187_v13, 0.0  ;;  %v2179_v21 = vadd.f32 %v3988_v51, %v2178_v8 }
 0x380   : > { %v2886_v25 = vpop.f32.mrf.mxu1 }
 0x381   : > { %2415 = vst.msk [vmem:[%s3145_s28 + $0x20] sm:$0xff] %vm2410_vm0, %v2398_v9  ;;  %v2401_v57 = vadd.f32 %v2359_v17, %v2229_v5  ;;  %v2227_v24 = vmax.f32 %v2179_v21, 0.0  ;;  %v2200_v56 = vadd.f32 %v2886_v25, %v3988_v51 }
 0x382   : > { %v2191_v63 = vpop.f32.mrf.mxu1 }
 0x383   : > { %2418 = vst.msk [vmem:[%s3145_s28 + $0x38] sm:$0xff] %vm2410_vm0, %v2401_v57  ;;  %v2399_v46 = vadd.f32 %v2351_v22, %v2227_v24  ;;  %v2232_v49 = vmax.f32 %v2200_v56, 0.0  ;;  %v2192_v42 = vadd.f32 %v3988_v51, %v2191_v63 }
 0x384   : > { %v2887_v12 = vpop.f32.mrf.mxu1 }
 0x385   : > { %2416 = vst.msk [vmem:[%s3145_s28 + $0x28] sm:$0xff] %vm2410_vm0, %v2399_v46  ;;  %v2404_v36 = vadd.f32 %v2372_v26, %v2232_v49  ;;  %v2230_v20 = vmax.f32 %v2192_v42, 0.0  ;;  %v2203_v33 = vadd.f32 %v2887_v12, %v3988_v51 }
 0x386   : > { %v2194_v55 = vpop.f32.mrf.mxu1 }
 0x387   : > { %2421 = vst.msk [vmem:[%s3145_s28 + $0x50] sm:$0xff] %vm2410_vm0, %v2404_v36  ;;  %v2402_v37 = vadd.f32 %v2364_v32, %v2230_v20  ;;  %v2233_v62 = vmax.f32 %v2203_v33, 0.0  ;;  %v2195_v50 = vadd.f32 %v3988_v51, %v2194_v55 }
 0x388   : > { %v2890_v15 = vpop.f32.mrf.mxu1 }
 0x389   : > { %2419 = vst.msk [vmem:[%s3145_s28 + $0x40] sm:$0xff] %vm2410_vm0, %v2402_v37  ;;  %v2405_v28 = vadd.f32 %v2375_v1, %v2233_v62  ;;  %v2231_v61 = vmax.f32 %v2195_v50, 0.0  ;;  %v2216_v48 = vadd.f32 %v2890_v15, %v3988_v51 }
 0x38a   : > { %v2207_v31 = vpop.f32.mrf.mxu1 }
 0x38b   : > { %2422 = vst.msk [vmem:[%s3145_s28 + $0x58] sm:$0xff] %vm2410_vm0, %v2405_v28  ;;  %v2403_v41 = vadd.f32 %v2367_v16, %v2231_v61  ;;  %v2236_v29 = vmax.f32 %v2216_v48, 0.0  ;;  %v2208_v53 = vadd.f32 %v3988_v51, %v2207_v31 }
 0x38c   : > { %v2891_v6 = vpop.f32.mrf.mxu1 }
 0x38d   : > { %2420 = vst.msk [vmem:[%s3145_s28 + $0x48] sm:$0xff] %vm2410_vm0, %v2403_v41  ;;  %v2408_v27 = vadd.f32 %v2388_v23, %v2236_v29  ;;  %v2234_v52 = vmax.f32 %v2208_v53, 0.0  ;;  %v2219_v58 = vadd.f32 %v2891_v6, %v3988_v51 }
 0x38e   : > { %v2210_v30 = vpop.f32.mrf.mxu1 }
 0x38f   : > { %2425 = vst.msk [vmem:[%s3145_s28 + $0x70] sm:$0xff] %vm2410_vm0, %v2408_v27  ;;  %v2406_v35 = vadd.f32 %v2380_v11, %v2234_v52  ;;  %v2237_v43 = vmax.f32 %v2219_v58, 0.0  ;;  %v2211_v10 = vadd.f32 %v3988_v51, %v2210_v30 }
 0x391   : > { %2423 = vst.msk [vmem:[%s3145_s28 + $0x60] sm:$0xff] %vm2410_vm0, %v2406_v35  ;;  %v2409_v39 = vadd.f32 %v2391_v44, %v2237_v43  ;;  %v2235_v18 = vmax.f32 %v2211_v10, 0.0 }
 0x393   : > { %2426 = vst.msk [vmem:[%s3145_s28 + $0x78] sm:$0xff] %vm2410_vm0, %v2409_v39  ;;  %v2407_v54 = vadd.f32 %v2383_v3, %v2235_v18 }
 0x395   : > { %2424 = vst.msk [vmem:[%s3145_s28 + $0x68] sm:$0xff] %vm2410_vm0, %v2407_v54 }
 0x396 PF: > { %s22_s25 = sadd.s32 1, %s3025_s25   ;;  %s4160_s29 = sld [smem:[#allocation3_spill]] }
 0x397   : > { %p19_p12 = scmp.ge.s32.totalorder %s22_s25, 6   ;;  %s4161_s21 = smov %s3017_s23 }
 0x398   : > { %s4162_s22 = smov %s3021_s24  ;;  %s4163_s23 = smov %s4166_s26 }
 0x399   :  { %21 = sbr.rel (!%p19_p12) target bundleno = 3 (0x3), region = 117 }
 0x39c   : > { %s4164_s24 = smov %s4160_s29 }

</bundles_post_ra>
